<compile_context>
chip_gen: v7x
topology: tpu7x:2x2x1
jax: 0.10.0
libtpu: 0.0.40
codegen_flags: <defaults>
</compile_context>

<pallas_src>
import functools

import numpy as np
import jax
import jax.numpy as jnp
from jax import lax
from jax.experimental import pallas as pl
from jax.experimental.pallas import tpu as pltpu


# ---------------------------------------------------------------------------
# Host-side helpers: 1-D Gaussian kernel and zero-padded Toeplitz operators.
# ---------------------------------------------------------------------------
def _gauss_kernel_1d(sigma):
    # Mirrors Retinex_shading.get_gauss_kernel(sigma, dim=1) in float32.
    ksize = int(np.floor(sigma * 6) / 2) * 2 + 1
    k = np.arange(ksize, dtype=np.float32) - np.float32(ksize // 2)
    k = np.exp(-(k ** 2) / np.float32(2.0 * sigma * sigma)).astype(np.float32)
    k = k / k.sum(dtype=np.float32)
    return k, ksize // 2


def _toeplitz(k1d, pad, n):
    # T[y, x] = k1d[pad + x - y] inside the kernel support, else 0.
    # T @ signal == 'same'-size zero-padded correlation (kernel is symmetric).
    idx = pad + np.arange(n)[None, :] - np.arange(n)[:, None]
    valid = (idx >= 0) & (idx < k1d.shape[0])
    return np.where(valid, k1d[np.clip(idx, 0, k1d.shape[0] - 1)],
                    np.float32(0.0)).astype(np.float32)


@functools.lru_cache(maxsize=8)
def _build_operators(H, Wp, sigmas):
    """Cached bf16 Toeplitz blur operators (device arrays) + band half-widths."""
    S = len(sigmas)
    vmats = np.zeros((S, H, H), dtype=np.float32)
    hmats_t = np.zeros((S, Wp, Wp), dtype=np.float32)
    pads = []
    for s, sigma in enumerate(sigmas):
        k1d, pad = _gauss_kernel_1d(sigma)
        vmats[s] = _toeplitz(k1d, pad, H)            # vertical pass (left-mul)
        hmats_t[s] = _toeplitz(k1d, pad, Wp).T       # horizontal pass (right-mul)
        pads.append(pad)
    return (jnp.asarray(vmats, dtype=jnp.bfloat16),
            jnp.asarray(hmats_t, dtype=jnp.bfloat16),
            tuple(pads))


# ---------------------------------------------------------------------------
# Pallas kernel: grid = (channel, scale).
# ---------------------------------------------------------------------------
_LANE = 128


def _rdown(v, m):
    return (v // m) * m


def _rup(v, m):
    return -((-v) // m) * m


def _blur_log_accumulate(vmat_ref, hmat_t_ref, x_ref, out_ref, t_ref, *,
                         pad, batch, h, wp, rb, cb, first):
    """One scale: banded separable blur + log(blur + 1) accumulation."""
    # Collapse to a single (dense) block when the band covers ~everything;
    # at small shapes this is exactly the previous dense kernel.
    rb_s = h if 2 * pad >= h else rb
    cb_s = wp if 2 * pad >= wp else cb
    for b in range(batch):                                   # static, small
        col0 = b * wp
        # --- vertical pass: T_v[band] @ x, contraction restricted to band ---
        for r0 in range(0, h, rb_s):
            r1 = min(r0 + rb_s, h)
            k0 = max(0, _rdown(r0 - pad, _LANE))
            k1 = min(h, _rup(r1 + pad, _LANE))
            tblk = jnp.dot(vmat_ref[r0:r1, k0:k1],
                           x_ref[k0:k1, col0:col0 + wp],
                           preferred_element_type=jnp.float32)
            t_ref[r0:r1, :] = tblk.astype(jnp.bfloat16)      # per-block cast
        # --- horizontal pass: t @ T_h^T[band], log, accumulate into out ---
        for c0 in range(0, wp, cb_s):
            c1 = min(c0 + cb_s, wp)
            k0 = max(0, _rdown(c0 - pad, _LANE))
            k1 = min(wp, _rup(c1 + pad, _LANE))
            blk = jnp.dot(t_ref[:, k0:k1],
                          hmat_t_ref[k0:k1, c0:c1],
                          preferred_element_type=jnp.float32)
            contrib = jnp.log(blk + 1.0)                     # f32 elementwise
            sl = slice(col0 + c0, col0 + c1)                 # lane-aligned
            if first:
                out_ref[:, sl] = contrib
            else:
                out_ref[:, sl] += contrib


def _retinex_kernel(vmat_ref, hmat_t_ref, x_ref, out_ref, t_ref, *,
                    batch, h, wp, w_valid, pads, rb, cb):
    # vmat_ref:   (H, H)    bf16 vertical Toeplitz operator of the CURRENT scale
    # hmat_t_ref: (Wp, Wp)  bf16 horizontal operator (already transposed)
    # x_ref:      (H, B*Wp) bf16 one channel, batch folded into the lanes
    # out_ref:    (H, B*Wp) f32  log accumulator across the scale grid axis
    # t_ref:      (H, Wp)   bf16 vertical-pass scratch
    s = pl.program_id(1)
    n_sig = len(pads)

    # One statically specialized (banded) branch per scale; only the branch
    # matching the current grid step runs at runtime.
    for si, pad in enumerate(pads):
        @pl.when(s == si)
        def _(pad=pad, first=(si == 0)):
            _blur_log_accumulate(vmat_ref, hmat_t_ref, x_ref, out_ref, t_ref,
                                 pad=pad, batch=batch, h=h, wp=wp,
                                 rb=rb, cb=cb, first=first)

    # After the last scale: per-channel min/max stretch over the whole
    # (batch, H, W) slab.  The equal 1/S weights cancel exactly here.
    @pl.when(s == n_sig - 1)
    def _():
        if w_valid == wp:
            valid = None
        else:
            lane = lax.broadcasted_iota(jnp.int32, (h, wp), 1)
            valid = lane < w_valid
        mmin = jnp.float32(jnp.inf)
        mmax = jnp.float32(-jnp.inf)
        for b in range(batch):                               # static, small
            ab = out_ref[:, b * wp:(b + 1) * wp]
            # Padded columns hold attenuated copies of valid values (input
            # images are non-negative), so only the min needs masking.
            mmax = jnp.maximum(mmax, jnp.max(ab))
            if valid is None:
                mmin = jnp.minimum(mmin, jnp.min(ab))
            else:
                mmin = jnp.minimum(mmin,
                                   jnp.min(jnp.where(valid, ab, jnp.inf)))
        # One scalar divide, then VPU multiply/add.  No epsilon on the
        # denominator, matching the PyTorch reference exactly.
        scale = jnp.float32(1.0) / (mmax - mmin)
        for b in range(batch):
            sl = slice(b * wp, (b + 1) * wp)
            out_ref[:, sl] = (out_ref[:, sl] - mmin) * scale


# ---------------------------------------------------------------------------
# Wrapper: layout plumbing (transpose / lane padding / bf16 cast) lives here.
# ---------------------------------------------------------------------------
def _vmem_limit_bytes(H, Wp, B):
    try:
        cap = int(pltpu.get_tpu_info().vmem_capacity_bytes)
    except Exception:
        cap = 128 * 1024 * 1024
    blk = H * B * Wp
    need = (2 * (H * H + Wp * Wp) * 2      # one scale's bf16 Toeplitz, 2 buffers
            + 2 * blk * 2                  # image block, bf16, 2 buffers
            + 2 * blk * 4                  # output block, f32, 2 buffers
            + H * Wp * 2                   # bf16 vertical-pass scratch
            + 6 * H * Wp * 4)              # in-kernel f32 temporaries
    return int(min(max(int(need * 1.3), 32 * 1024 * 1024),
                   cap - 8 * 1024 * 1024))


def gauss_retinex_cal(img, sigmas=(15, 80, 250), *, rb=256, cb=256):
    """Forward pass of gaussRetinexCal.  img: (B, C, H, W) float, NCHW."""
    B, C, H, W = img.shape
    S = len(sigmas)
    Wp = ((W + 127) // 128) * 128          # pad the lane dim to a 128 multiple

    vmats, hmats_t, pads = _build_operators(H, Wp, tuple(sigmas))

    # (B, C, H, W) -> (C, H, B*Wp): one channel's whole batch per grid step.
    x = jnp.transpose(img, (1, 2, 0, 3))           # (C, H, B, W)
    if Wp != W:
        x = jnp.pad(x, ((0, 0), (0, 0), (0, 0), (0, Wp - W)))
    x = x.reshape(C, H, B * Wp).astype(jnp.bfloat16)

    kernel = functools.partial(_retinex_kernel, batch=B, h=H, wp=Wp,
                               w_valid=W, pads=pads, rb=rb, cb=cb)

    out = pl.pallas_call(
        kernel,
        out_shape=jax.ShapeDtypeStruct((C, H, B * Wp), jnp.float32),
        grid=(C, S),
        in_specs=[
            pl.BlockSpec((None, H, H), lambda c, s: (s, 0, 0)),
            pl.BlockSpec((None, Wp, Wp), lambda c, s: (s, 0, 0)),
            pl.BlockSpec((None, H, B * Wp), lambda c, s: (c, 0, 0)),
        ],
        out_specs=pl.BlockSpec((None, H, B * Wp), lambda c, s: (c, 0, 0)),
        scratch_shapes=[pltpu.VMEM((H, Wp), jnp.bfloat16)],
        compiler_params=pltpu.CompilerParams(
            dimension_semantics=("parallel", "arbitrary"),
            vmem_limit_bytes=_vmem_limit_bytes(H, Wp, B)),
    )(vmats, hmats_t, x)

    # (C, H, B*Wp) -> (B, C, H, W): undo padding and layout plumbing.
    out = out.reshape(C, H, B, Wp)
    out = jnp.transpose(out, (2, 0, 1, 3))[:, :, :, :W]
    return out.astype(img.dtype)


# ---------------------------------------------------------------------------
# Pure-JAX f32 reference (same Toeplitz formulation) for a correctness check.
# ---------------------------------------------------------------------------
def _retinex_reference(img, sigmas=(15, 80, 250)):
    B, C, H, W = img.shape
    x = jnp.asarray(img, jnp.float32)
    chans = []
    for c in range(C):
        ch = x[:, c]                                   # (B, H, W)
        r = jnp.zeros_like(ch)
        for sigma in sigmas:
            k1d, pad = _gauss_kernel_1d(sigma)
            tv = jnp.asarray(_toeplitz(k1d, pad, H))
            th = jnp.asarray(_toeplitz(k1d, pad, W))
            blur = jnp.einsum('ij,bjk->bik', tv, ch)
            blur = jnp.einsum('bix,jx->bij', blur, th)
            r = r + jnp.log(blur + 1.0) / len(sigmas)
        r = (r - jnp.min(r)) / (jnp.max(r) - jnp.min(r))
        chans.append(r)
    return jnp.stack(chans, axis=1).astype(img.dtype)


if __name__ == "__main__":
    key = jax.random.PRNGKey(0)
    # Small shapes consistent with the module's forward: NCHW image.
    img = jax.random.uniform(key, (2, 4, 16, 16), dtype=jnp.float32)

    out = gauss_retinex_cal(img)
    out = jax.block_until_ready(out)

    assert out.shape == img.shape and out.dtype == img.dtype
    assert bool(jnp.all(jnp.isfinite(out)))
    # The min/max stretch maps each channel into [0, 1].
    assert float(jnp.min(out)) >= -1e-5 and float(jnp.max(out)) <= 1.0 + 1e-5

    # Numerical check vs the f32 reference (bf16 MXU operands -> loose atol).
    ref = _retinex_reference(img)
    err = float(jnp.max(jnp.abs(out - ref)))
    assert err < 5e-2, f"max abs error vs reference: {err}"

    print("KERNEL_OK")
</pallas_src>

<mosaic_0001>
module attributes {stable_mosaic.version = 11 : i64} {
  func.func @_retinex_kernel(%arg0: i32, %arg1: i32, %arg2: memref<1x16x16xbf16, #tpu.memory_space<vmem>>, %arg3: memref<1x128x128xbf16, #tpu.memory_space<vmem>>, %arg4: memref<1x16x256xbf16, #tpu.memory_space<vmem>>, %arg5: memref<1x16x256xf32, #tpu.memory_space<vmem>>, %arg6: memref<16x128xbf16, #tpu.memory_space<vmem>>) attributes {dimension_semantics = [#tpu.dimension_semantics<parallel>, #tpu.dimension_semantics<arbitrary>], iteration_bounds = array<i64: 4, 3>, scalar_prefetch = 0 : i64, scratch_operands = 1 : i64, tpu.core_type = #tpu.core_type<tc>, window_params = [{transform_indices = @transform_0, window_bounds = array<i64: 1, 16, 16>}, {transform_indices = @transform_1, window_bounds = array<i64: 1, 128, 128>}, {transform_indices = @transform_2, window_bounds = array<i64: 1, 16, 256>}, {transform_indices = @transform_3, window_bounds = array<i64: 1, 16, 256>}]} {
    %c0_i32 = arith.constant 0 : i32
    %0 = arith.cmpi eq, %arg1, %c0_i32 : i32
    %1 = arith.extui %0 : i1 to i32
    %c0_i32_0 = arith.constant 0 : i32
    %2 = arith.cmpi ne, %1, %c0_i32_0 : i32
    scf.if %2 {
      %c0 = arith.constant 0 : index
      %c0_5 = arith.constant 0 : index
      %c0_6 = arith.constant 0 : index
      %12 = vector.load %arg2[%c0, %c0_5, %c0_6] : memref<1x16x16xbf16, #tpu.memory_space<vmem>>, vector<1x16x16xbf16>
      %13 = vector.shape_cast %12 : vector<1x16x16xbf16> to vector<16x16xbf16>
      %c0_7 = arith.constant 0 : index
      %c0_8 = arith.constant 0 : index
      %c0_9 = arith.constant 0 : index
      %14 = vector.load %arg4[%c0_7, %c0_8, %c0_9] : memref<1x16x256xbf16, #tpu.memory_space<vmem>>, vector<1x16x128xbf16>
      %15 = vector.shape_cast %14 : vector<1x16x128xbf16> to vector<16x128xbf16>
      %cst = arith.constant dense<0.000000e+00> : vector<16x128xf32>
      %16 = tpu.matmul %13, %15, %cst {dimension_numbers = #tpu.dot_dimension_numbers<[1], [0], [0], [1], [0, 0, 1, 1], [], []>} : vector<16x16xbf16>, vector<16x128xbf16>, vector<16x128xf32> -> vector<16x128xf32>
      %17 = arith.truncf %16 : vector<16x128xf32> to vector<16x128xbf16>
      %c0_10 = arith.constant 0 : index
      %c0_11 = arith.constant 0 : index
      %18 = vector.load %arg6[%c0_10, %c0_11] : memref<16x128xbf16, #tpu.memory_space<vmem>>, vector<16x128xbf16>
      tpu.vector_store %arg6[%c0_10, %c0_11], %17 {strides = array<i32>} : memref<16x128xbf16, #tpu.memory_space<vmem>>, vector<16x128xbf16>,
      %c0_12 = arith.constant 0 : index
      %c0_13 = arith.constant 0 : index
      %19 = vector.load %arg6[%c0_12, %c0_13] : memref<16x128xbf16, #tpu.memory_space<vmem>>, vector<16x128xbf16>
      %c0_14 = arith.constant 0 : index
      %c0_15 = arith.constant 0 : index
      %c0_16 = arith.constant 0 : index
      %20 = vector.load %arg3[%c0_14, %c0_15, %c0_16] : memref<1x128x128xbf16, #tpu.memory_space<vmem>>, vector<1x128x128xbf16>
      %21 = vector.shape_cast %20 : vector<1x128x128xbf16> to vector<128x128xbf16>
      %cst_17 = arith.constant dense<0.000000e+00> : vector<16x128xf32>
      %22 = tpu.matmul %19, %21, %cst_17 {dimension_numbers = #tpu.dot_dimension_numbers<[1], [0], [0], [1], [0, 0, 1, 1], [], []>} : vector<16x128xbf16>, vector<128x128xbf16>, vector<16x128xf32> -> vector<16x128xf32>
      %cst_18 = arith.constant 1.000000e+00 : f32
      %23 = vector.broadcast %cst_18 : f32 to vector<16x128xf32>
      %24 = arith.addf %22, %23 : vector<16x128xf32>
      %25 = math.log %24 : vector<16x128xf32>
      %c0_19 = arith.constant 0 : index
      %c0_20 = arith.constant 0 : index
      %c0_21 = arith.constant 0 : index
      %26 = vector.load %arg5[%c0_19, %c0_20, %c0_21] : memref<1x16x256xf32, #tpu.memory_space<vmem>>, vector<1x16x128xf32>
      %27 = vector.shape_cast %26 : vector<1x16x128xf32> to vector<16x128xf32>
      %28 = vector.shape_cast %25 : vector<16x128xf32> to vector<1x16x128xf32>
      tpu.vector_store %arg5[%c0_19, %c0_20, %c0_21], %28 {strides = array<i32>} : memref<1x16x256xf32, #tpu.memory_space<vmem>>, vector<1x16x128xf32>,
      %c0_22 = arith.constant 0 : index
      %c0_23 = arith.constant 0 : index
      %c0_24 = arith.constant 0 : index
      %29 = vector.load %arg2[%c0_22, %c0_23, %c0_24] : memref<1x16x16xbf16, #tpu.memory_space<vmem>>, vector<1x16x16xbf16>
      %30 = vector.shape_cast %29 : vector<1x16x16xbf16> to vector<16x16xbf16>
      %c0_25 = arith.constant 0 : index
      %c0_26 = arith.constant 0 : index
      %c128 = arith.constant 128 : index
      %31 = vector.load %arg4[%c0_25, %c0_26, %c128] : memref<1x16x256xbf16, #tpu.memory_space<vmem>>, vector<1x16x128xbf16>
      %32 = vector.shape_cast %31 : vector<1x16x128xbf16> to vector<16x128xbf16>
      %cst_27 = arith.constant dense<0.000000e+00> : vector<16x128xf32>
      %33 = tpu.matmul %30, %32, %cst_27 {dimension_numbers = #tpu.dot_dimension_numbers<[1], [0], [0], [1], [0, 0, 1, 1], [], []>} : vector<16x16xbf16>, vector<16x128xbf16>, vector<16x128xf32> -> vector<16x128xf32>
      %34 = arith.truncf %33 : vector<16x128xf32> to vector<16x128xbf16>
      %c0_28 = arith.constant 0 : index
      %c0_29 = arith.constant 0 : index
      %35 = vector.load %arg6[%c0_28, %c0_29] : memref<16x128xbf16, #tpu.memory_space<vmem>>, vector<16x128xbf16>
      tpu.vector_store %arg6[%c0_28, %c0_29], %34 {strides = array<i32>} : memref<16x128xbf16, #tpu.memory_space<vmem>>, vector<16x128xbf16>,
      %c0_30 = arith.constant 0 : index
      %c0_31 = arith.constant 0 : index
      %36 = vector.load %arg6[%c0_30, %c0_31] : memref<16x128xbf16, #tpu.memory_space<vmem>>, vector<16x128xbf16>
      %c0_32 = arith.constant 0 : index
      %c0_33 = arith.constant 0 : index
      %c0_34 = arith.constant 0 : index
      %37 = vector.load %arg3[%c0_32, %c0_33, %c0_34] : memref<1x128x128xbf16, #tpu.memory_space<vmem>>, vector<1x128x128xbf16>
      %38 = vector.shape_cast %37 : vector<1x128x128xbf16> to vector<128x128xbf16>
      %cst_35 = arith.constant dense<0.000000e+00> : vector<16x128xf32>
      %39 = tpu.matmul %36, %38, %cst_35 {dimension_numbers = #tpu.dot_dimension_numbers<[1], [0], [0], [1], [0, 0, 1, 1], [], []>} : vector<16x128xbf16>, vector<128x128xbf16>, vector<16x128xf32> -> vector<16x128xf32>
      %cst_36 = arith.constant 1.000000e+00 : f32
      %40 = vector.broadcast %cst_36 : f32 to vector<16x128xf32>
      %41 = arith.addf %39, %40 : vector<16x128xf32>
      %42 = math.log %41 : vector<16x128xf32>
      %c0_37 = arith.constant 0 : index
      %c0_38 = arith.constant 0 : index
      %c128_39 = arith.constant 128 : index
      %43 = vector.load %arg5[%c0_37, %c0_38, %c128_39] : memref<1x16x256xf32, #tpu.memory_space<vmem>>, vector<1x16x128xf32>
      %44 = vector.shape_cast %43 : vector<1x16x128xf32> to vector<16x128xf32>
      %45 = vector.shape_cast %42 : vector<16x128xf32> to vector<1x16x128xf32>
      tpu.vector_store %arg5[%c0_37, %c0_38, %c128_39], %45 {strides = array<i32>} : memref<1x16x256xf32, #tpu.memory_space<vmem>>, vector<1x16x128xf32>,
    } else {
    }
    %c1_i32 = arith.constant 1 : i32
    %3 = arith.cmpi eq, %arg1, %c1_i32 : i32
    %4 = arith.extui %3 : i1 to i32
    %c0_i32_1 = arith.constant 0 : i32
    %5 = arith.cmpi ne, %4, %c0_i32_1 : i32
    scf.if %5 {
      %c0 = arith.constant 0 : index
      %c0_5 = arith.constant 0 : index
      %c0_6 = arith.constant 0 : index
      %12 = vector.load %arg2[%c0, %c0_5, %c0_6] : memref<1x16x16xbf16, #tpu.memory_space<vmem>>, vector<1x16x16xbf16>
      %13 = vector.shape_cast %12 : vector<1x16x16xbf16> to vector<16x16xbf16>
      %c0_7 = arith.constant 0 : index
      %c0_8 = arith.constant 0 : index
      %c0_9 = arith.constant 0 : index
      %14 = vector.load %arg4[%c0_7, %c0_8, %c0_9] : memref<1x16x256xbf16, #tpu.memory_space<vmem>>, vector<1x16x128xbf16>
      %15 = vector.shape_cast %14 : vector<1x16x128xbf16> to vector<16x128xbf16>
      %cst = arith.constant dense<0.000000e+00> : vector<16x128xf32>
      %16 = tpu.matmul %13, %15, %cst {dimension_numbers = #tpu.dot_dimension_numbers<[1], [0], [0], [1], [0, 0, 1, 1], [], []>} : vector<16x16xbf16>, vector<16x128xbf16>, vector<16x128xf32> -> vector<16x128xf32>
      %17 = arith.truncf %16 : vector<16x128xf32> to vector<16x128xbf16>
      %c0_10 = arith.constant 0 : index
      %c0_11 = arith.constant 0 : index
      %18 = vector.load %arg6[%c0_10, %c0_11] : memref<16x128xbf16, #tpu.memory_space<vmem>>, vector<16x128xbf16>
      tpu.vector_store %arg6[%c0_10, %c0_11], %17 {strides = array<i32>} : memref<16x128xbf16, #tpu.memory_space<vmem>>, vector<16x128xbf16>,
      %c0_12 = arith.constant 0 : index
      %c0_13 = arith.constant 0 : index
      %19 = vector.load %arg6[%c0_12, %c0_13] : memref<16x128xbf16, #tpu.memory_space<vmem>>, vector<16x128xbf16>
      %c0_14 = arith.constant 0 : index
      %c0_15 = arith.constant 0 : index
      %c0_16 = arith.constant 0 : index
      %20 = vector.load %arg3[%c0_14, %c0_15, %c0_16] : memref<1x128x128xbf16, #tpu.memory_space<vmem>>, vector<1x128x128xbf16>
      %21 = vector.shape_cast %20 : vector<1x128x128xbf16> to vector<128x128xbf16>
      %cst_17 = arith.constant dense<0.000000e+00> : vector<16x128xf32>
      %22 = tpu.matmul %19, %21, %cst_17 {dimension_numbers = #tpu.dot_dimension_numbers<[1], [0], [0], [1], [0, 0, 1, 1], [], []>} : vector<16x128xbf16>, vector<128x128xbf16>, vector<16x128xf32> -> vector<16x128xf32>
      %cst_18 = arith.constant 1.000000e+00 : f32
      %23 = vector.broadcast %cst_18 : f32 to vector<16x128xf32>
      %24 = arith.addf %22, %23 : vector<16x128xf32>
      %25 = math.log %24 : vector<16x128xf32>
      %c0_19 = arith.constant 0 : index
      %c0_20 = arith.constant 0 : index
      %c0_21 = arith.constant 0 : index
      %26 = vector.load %arg5[%c0_19, %c0_20, %c0_21] : memref<1x16x256xf32, #tpu.memory_space<vmem>>, vector<1x16x128xf32>
      %27 = vector.shape_cast %26 : vector<1x16x128xf32> to vector<16x128xf32>
      %28 = arith.addf %27, %25 : vector<16x128xf32>
      %c0_22 = arith.constant 0 : index
      %c0_23 = arith.constant 0 : index
      %c0_24 = arith.constant 0 : index
      %29 = vector.load %arg5[%c0_22, %c0_23, %c0_24] : memref<1x16x256xf32, #tpu.memory_space<vmem>>, vector<1x16x128xf32>
      %30 = vector.shape_cast %29 : vector<1x16x128xf32> to vector<16x128xf32>
      %31 = vector.shape_cast %28 : vector<16x128xf32> to vector<1x16x128xf32>
      tpu.vector_store %arg5[%c0_22, %c0_23, %c0_24], %31 {strides = array<i32>} : memref<1x16x256xf32, #tpu.memory_space<vmem>>, vector<1x16x128xf32>,
      %c0_25 = arith.constant 0 : index
      %c0_26 = arith.constant 0 : index
      %c0_27 = arith.constant 0 : index
      %32 = vector.load %arg2[%c0_25, %c0_26, %c0_27] : memref<1x16x16xbf16, #tpu.memory_space<vmem>>, vector<1x16x16xbf16>
      %33 = vector.shape_cast %32 : vector<1x16x16xbf16> to vector<16x16xbf16>
      %c0_28 = arith.constant 0 : index
      %c0_29 = arith.constant 0 : index
      %c128 = arith.constant 128 : index
      %34 = vector.load %arg4[%c0_28, %c0_29, %c128] : memref<1x16x256xbf16, #tpu.memory_space<vmem>>, vector<1x16x128xbf16>
      %35 = vector.shape_cast %34 : vector<1x16x128xbf16> to vector<16x128xbf16>
      %cst_30 = arith.constant dense<0.000000e+00> : vector<16x128xf32>
      %36 = tpu.matmul %33, %35, %cst_30 {dimension_numbers = #tpu.dot_dimension_numbers<[1], [0], [0], [1], [0, 0, 1, 1], [], []>} : vector<16x16xbf16>, vector<16x128xbf16>, vector<16x128xf32> -> vector<16x128xf32>
      %37 = arith.truncf %36 : vector<16x128xf32> to vector<16x128xbf16>
      %c0_31 = arith.constant 0 : index
      %c0_32 = arith.constant 0 : index
      %38 = vector.load %arg6[%c0_31, %c0_32] : memref<16x128xbf16, #tpu.memory_space<vmem>>, vector<16x128xbf16>
      tpu.vector_store %arg6[%c0_31, %c0_32], %37 {strides = array<i32>} : memref<16x128xbf16, #tpu.memory_space<vmem>>, vector<16x128xbf16>,
      %c0_33 = arith.constant 0 : index
      %c0_34 = arith.constant 0 : index
      %39 = vector.load %arg6[%c0_33, %c0_34] : memref<16x128xbf16, #tpu.memory_space<vmem>>, vector<16x128xbf16>
      %c0_35 = arith.constant 0 : index
      %c0_36 = arith.constant 0 : index
      %c0_37 = arith.constant 0 : index
      %40 = vector.load %arg3[%c0_35, %c0_36, %c0_37] : memref<1x128x128xbf16, #tpu.memory_space<vmem>>, vector<1x128x128xbf16>
      %41 = vector.shape_cast %40 : vector<1x128x128xbf16> to vector<128x128xbf16>
      %cst_38 = arith.constant dense<0.000000e+00> : vector<16x128xf32>
      %42 = tpu.matmul %39, %41, %cst_38 {dimension_numbers = #tpu.dot_dimension_numbers<[1], [0], [0], [1], [0, 0, 1, 1], [], []>} : vector<16x128xbf16>, vector<128x128xbf16>, vector<16x128xf32> -> vector<16x128xf32>
      %cst_39 = arith.constant 1.000000e+00 : f32
      %43 = vector.broadcast %cst_39 : f32 to vector<16x128xf32>
      %44 = arith.addf %42, %43 : vector<16x128xf32>
      %45 = math.log %44 : vector<16x128xf32>
      %c0_40 = arith.constant 0 : index
      %c0_41 = arith.constant 0 : index
      %c128_42 = arith.constant 128 : index
      %46 = vector.load %arg5[%c0_40, %c0_41, %c128_42] : memref<1x16x256xf32, #tpu.memory_space<vmem>>, vector<1x16x128xf32>
      %47 = vector.shape_cast %46 : vector<1x16x128xf32> to vector<16x128xf32>
      %48 = arith.addf %47, %45 : vector<16x128xf32>
      %c0_43 = arith.constant 0 : index
      %c0_44 = arith.constant 0 : index
      %c128_45 = arith.constant 128 : index
      %49 = vector.load %arg5[%c0_43, %c0_44, %c128_45] : memref<1x16x256xf32, #tpu.memory_space<vmem>>, vector<1x16x128xf32>
      %50 = vector.shape_cast %49 : vector<1x16x128xf32> to vector<16x128xf32>
      %51 = vector.shape_cast %48 : vector<16x128xf32> to vector<1x16x128xf32>
      tpu.vector_store %arg5[%c0_43, %c0_44, %c128_45], %51 {strides = array<i32>} : memref<1x16x256xf32, #tpu.memory_space<vmem>>, vector<1x16x128xf32>,
    } else {
    }
    %c2_i32 = arith.constant 2 : i32
    %6 = arith.cmpi eq, %arg1, %c2_i32 : i32
    %7 = arith.extui %6 : i1 to i32
    %c0_i32_2 = arith.constant 0 : i32
    %8 = arith.cmpi ne, %7, %c0_i32_2 : i32
    scf.if %8 {
      %c0 = arith.constant 0 : index
      %c0_5 = arith.constant 0 : index
      %c0_6 = arith.constant 0 : index
      %12 = vector.load %arg2[%c0, %c0_5, %c0_6] : memref<1x16x16xbf16, #tpu.memory_space<vmem>>, vector<1x16x16xbf16>
      %13 = vector.shape_cast %12 : vector<1x16x16xbf16> to vector<16x16xbf16>
      %c0_7 = arith.constant 0 : index
      %c0_8 = arith.constant 0 : index
      %c0_9 = arith.constant 0 : index
      %14 = vector.load %arg4[%c0_7, %c0_8, %c0_9] : memref<1x16x256xbf16, #tpu.memory_space<vmem>>, vector<1x16x128xbf16>
      %15 = vector.shape_cast %14 : vector<1x16x128xbf16> to vector<16x128xbf16>
      %cst = arith.constant dense<0.000000e+00> : vector<16x128xf32>
      %16 = tpu.matmul %13, %15, %cst {dimension_numbers = #tpu.dot_dimension_numbers<[1], [0], [0], [1], [0, 0, 1, 1], [], []>} : vector<16x16xbf16>, vector<16x128xbf16>, vector<16x128xf32> -> vector<16x128xf32>
      %17 = arith.truncf %16 : vector<16x128xf32> to vector<16x128xbf16>
      %c0_10 = arith.constant 0 : index
      %c0_11 = arith.constant 0 : index
      %18 = vector.load %arg6[%c0_10, %c0_11] : memref<16x128xbf16, #tpu.memory_space<vmem>>, vector<16x128xbf16>
      tpu.vector_store %arg6[%c0_10, %c0_11], %17 {strides = array<i32>} : memref<16x128xbf16, #tpu.memory_space<vmem>>, vector<16x128xbf16>,
      %c0_12 = arith.constant 0 : index
      %c0_13 = arith.constant 0 : index
      %19 = vector.load %arg6[%c0_12, %c0_13] : memref<16x128xbf16, #tpu.memory_space<vmem>>, vector<16x128xbf16>
      %c0_14 = arith.constant 0 : index
      %c0_15 = arith.constant 0 : index
      %c0_16 = arith.constant 0 : index
      %20 = vector.load %arg3[%c0_14, %c0_15, %c0_16] : memref<1x128x128xbf16, #tpu.memory_space<vmem>>, vector<1x128x128xbf16>
      %21 = vector.shape_cast %20 : vector<1x128x128xbf16> to vector<128x128xbf16>
      %cst_17 = arith.constant dense<0.000000e+00> : vector<16x128xf32>
      %22 = tpu.matmul %19, %21, %cst_17 {dimension_numbers = #tpu.dot_dimension_numbers<[1], [0], [0], [1], [0, 0, 1, 1], [], []>} : vector<16x128xbf16>, vector<128x128xbf16>, vector<16x128xf32> -> vector<16x128xf32>
      %cst_18 = arith.constant 1.000000e+00 : f32
      %23 = vector.broadcast %cst_18 : f32 to vector<16x128xf32>
      %24 = arith.addf %22, %23 : vector<16x128xf32>
      %25 = math.log %24 : vector<16x128xf32>
      %c0_19 = arith.constant 0 : index
      %c0_20 = arith.constant 0 : index
      %c0_21 = arith.constant 0 : index
      %26 = vector.load %arg5[%c0_19, %c0_20, %c0_21] : memref<1x16x256xf32, #tpu.memory_space<vmem>>, vector<1x16x128xf32>
      %27 = vector.shape_cast %26 : vector<1x16x128xf32> to vector<16x128xf32>
      %28 = arith.addf %27, %25 : vector<16x128xf32>
      %c0_22 = arith.constant 0 : index
      %c0_23 = arith.constant 0 : index
      %c0_24 = arith.constant 0 : index
      %29 = vector.load %arg5[%c0_22, %c0_23, %c0_24] : memref<1x16x256xf32, #tpu.memory_space<vmem>>, vector<1x16x128xf32>
      %30 = vector.shape_cast %29 : vector<1x16x128xf32> to vector<16x128xf32>
      %31 = vector.shape_cast %28 : vector<16x128xf32> to vector<1x16x128xf32>
      tpu.vector_store %arg5[%c0_22, %c0_23, %c0_24], %31 {strides = array<i32>} : memref<1x16x256xf32, #tpu.memory_space<vmem>>, vector<1x16x128xf32>,
      %c0_25 = arith.constant 0 : index
      %c0_26 = arith.constant 0 : index
      %c0_27 = arith.constant 0 : index
      %32 = vector.load %arg2[%c0_25, %c0_26, %c0_27] : memref<1x16x16xbf16, #tpu.memory_space<vmem>>, vector<1x16x16xbf16>
      %33 = vector.shape_cast %32 : vector<1x16x16xbf16> to vector<16x16xbf16>
      %c0_28 = arith.constant 0 : index
      %c0_29 = arith.constant 0 : index
      %c128 = arith.constant 128 : index
      %34 = vector.load %arg4[%c0_28, %c0_29, %c128] : memref<1x16x256xbf16, #tpu.memory_space<vmem>>, vector<1x16x128xbf16>
      %35 = vector.shape_cast %34 : vector<1x16x128xbf16> to vector<16x128xbf16>
      %cst_30 = arith.constant dense<0.000000e+00> : vector<16x128xf32>
      %36 = tpu.matmul %33, %35, %cst_30 {dimension_numbers = #tpu.dot_dimension_numbers<[1], [0], [0], [1], [0, 0, 1, 1], [], []>} : vector<16x16xbf16>, vector<16x128xbf16>, vector<16x128xf32> -> vector<16x128xf32>
      %37 = arith.truncf %36 : vector<16x128xf32> to vector<16x128xbf16>
      %c0_31 = arith.constant 0 : index
      %c0_32 = arith.constant 0 : index
      %38 = vector.load %arg6[%c0_31, %c0_32] : memref<16x128xbf16, #tpu.memory_space<vmem>>, vector<16x128xbf16>
      tpu.vector_store %arg6[%c0_31, %c0_32], %37 {strides = array<i32>} : memref<16x128xbf16, #tpu.memory_space<vmem>>, vector<16x128xbf16>,
      %c0_33 = arith.constant 0 : index
      %c0_34 = arith.constant 0 : index
      %39 = vector.load %arg6[%c0_33, %c0_34] : memref<16x128xbf16, #tpu.memory_space<vmem>>, vector<16x128xbf16>
      %c0_35 = arith.constant 0 : index
      %c0_36 = arith.constant 0 : index
      %c0_37 = arith.constant 0 : index
      %40 = vector.load %arg3[%c0_35, %c0_36, %c0_37] : memref<1x128x128xbf16, #tpu.memory_space<vmem>>, vector<1x128x128xbf16>
      %41 = vector.shape_cast %40 : vector<1x128x128xbf16> to vector<128x128xbf16>
      %cst_38 = arith.constant dense<0.000000e+00> : vector<16x128xf32>
      %42 = tpu.matmul %39, %41, %cst_38 {dimension_numbers = #tpu.dot_dimension_numbers<[1], [0], [0], [1], [0, 0, 1, 1], [], []>} : vector<16x128xbf16>, vector<128x128xbf16>, vector<16x128xf32> -> vector<16x128xf32>
      %cst_39 = arith.constant 1.000000e+00 : f32
      %43 = vector.broadcast %cst_39 : f32 to vector<16x128xf32>
      %44 = arith.addf %42, %43 : vector<16x128xf32>
      %45 = math.log %44 : vector<16x128xf32>
      %c0_40 = arith.constant 0 : index
      %c0_41 = arith.constant 0 : index
      %c128_42 = arith.constant 128 : index
      %46 = vector.load %arg5[%c0_40, %c0_41, %c128_42] : memref<1x16x256xf32, #tpu.memory_space<vmem>>, vector<1x16x128xf32>
      %47 = vector.shape_cast %46 : vector<1x16x128xf32> to vector<16x128xf32>
      %48 = arith.addf %47, %45 : vector<16x128xf32>
      %c0_43 = arith.constant 0 : index
      %c0_44 = arith.constant 0 : index
      %c128_45 = arith.constant 128 : index
      %49 = vector.load %arg5[%c0_43, %c0_44, %c128_45] : memref<1x16x256xf32, #tpu.memory_space<vmem>>, vector<1x16x128xf32>
      %50 = vector.shape_cast %49 : vector<1x16x128xf32> to vector<16x128xf32>
      %51 = vector.shape_cast %48 : vector<16x128xf32> to vector<1x16x128xf32>
      tpu.vector_store %arg5[%c0_43, %c0_44, %c128_45], %51 {strides = array<i32>} : memref<1x16x256xf32, #tpu.memory_space<vmem>>, vector<1x16x128xf32>,
    } else {
    }
    %c2_i32_3 = arith.constant 2 : i32
    %9 = arith.cmpi eq, %arg1, %c2_i32_3 : i32
    %10 = arith.extui %9 : i1 to i32
    %c0_i32_4 = arith.constant 0 : i32
    %11 = arith.cmpi ne, %10, %c0_i32_4 : i32
    scf.if %11 {
      %12 = tpu.iota {dimensions = array<i32: 1>} : vector<16x128xi32>
      %c16_i32 = arith.constant 16 : i32
      %13 = vector.broadcast %c16_i32 : i32 to vector<16x128xi32>
      %14 = arith.cmpi slt, %12, %13 : vector<16x128xi32>
      %c0 = arith.constant 0 : index
      %c0_5 = arith.constant 0 : index
      %c0_6 = arith.constant 0 : index
      %15 = vector.load %arg5[%c0, %c0_5, %c0_6] : memref<1x16x256xf32, #tpu.memory_space<vmem>>, vector<1x16x128xf32>
      %16 = vector.shape_cast %15 : vector<1x16x128xf32> to vector<16x128xf32>
      %17 = vector.shape_cast %16 : vector<16x128xf32> to vector<1x16x128xf32>
      %cst = arith.constant dense<0xFF800000> : vector<1xf32>
      %18 = vector.multi_reduction <maximumf>, %17, %cst [1, 2] : vector<1x16x128xf32> to vector<1xf32>
      %19 = vector.shape_cast %18 : vector<1xf32> to vector<1x1x1xf32>
      %20 = vector.extract %19[0, 0, 0] : f32 from vector<1x1x1xf32>
      %cst_7 = arith.constant 0xFF800000 : f32
      %21 = arith.maximumf %cst_7, %20 : f32
      %cst_8 = arith.constant 0x7F800000 : f32
      %22 = vector.broadcast %cst_8 : f32 to vector<16x128xf32>
      %23 = arith.select %14, %16, %22 : vector<16x128xi1>, vector<16x128xf32>
      %24 = vector.shape_cast %23 : vector<16x128xf32> to vector<1x16x128xf32>
      %cst_9 = arith.constant dense<0x7F800000> : vector<1xf32>
      %25 = vector.multi_reduction <minimumf>, %24, %cst_9 [1, 2] : vector<1x16x128xf32> to vector<1xf32>
      %26 = vector.shape_cast %25 : vector<1xf32> to vector<1x1x1xf32>
      %27 = vector.extract %26[0, 0, 0] : f32 from vector<1x1x1xf32>
      %cst_10 = arith.constant 0x7F800000 : f32
      %28 = arith.minimumf %cst_10, %27 : f32
      %c0_11 = arith.constant 0 : index
      %c0_12 = arith.constant 0 : index
      %c128 = arith.constant 128 : index
      %29 = vector.load %arg5[%c0_11, %c0_12, %c128] : memref<1x16x256xf32, #tpu.memory_space<vmem>>, vector<1x16x128xf32>
      %30 = vector.shape_cast %29 : vector<1x16x128xf32> to vector<16x128xf32>
      %31 = vector.shape_cast %30 : vector<16x128xf32> to vector<1x16x128xf32>
      %cst_13 = arith.constant dense<0xFF800000> : vector<1xf32>
      %32 = vector.multi_reduction <maximumf>, %31, %cst_13 [1, 2] : vector<1x16x128xf32> to vector<1xf32>
      %33 = vector.shape_cast %32 : vector<1xf32> to vector<1x1x1xf32>
      %34 = vector.extract %33[0, 0, 0] : f32 from vector<1x1x1xf32>
      %35 = arith.maximumf %21, %34 : f32
      %cst_14 = arith.constant 0x7F800000 : f32
      %36 = vector.broadcast %cst_14 : f32 to vector<16x128xf32>
      %37 = arith.select %14, %30, %36 : vector<16x128xi1>, vector<16x128xf32>
      %38 = vector.shape_cast %37 : vector<16x128xf32> to vector<1x16x128xf32>
      %cst_15 = arith.constant dense<0x7F800000> : vector<1xf32>
      %39 = vector.multi_reduction <minimumf>, %38, %cst_15 [1, 2] : vector<1x16x128xf32> to vector<1xf32>
      %40 = vector.shape_cast %39 : vector<1xf32> to vector<1x1x1xf32>
      %41 = vector.extract %40[0, 0, 0] : f32 from vector<1x1x1xf32>
      %42 = arith.minimumf %28, %41 : f32
      %43 = arith.subf %35, %42 : f32
      %cst_16 = arith.constant 1.000000e+00 : f32
      %44 = arith.divf %cst_16, %43 : f32
      %c0_17 = arith.constant 0 : index
      %c0_18 = arith.constant 0 : index
      %c0_19 = arith.constant 0 : index
      %45 = vector.load %arg5[%c0_17, %c0_18, %c0_19] : memref<1x16x256xf32, #tpu.memory_space<vmem>>, vector<1x16x128xf32>
      %46 = vector.shape_cast %45 : vector<1x16x128xf32> to vector<16x128xf32>
      %47 = vector.broadcast %42 : f32 to vector<16x128xf32>
      %48 = arith.subf %46, %47 : vector<16x128xf32>
      %49 = vector.broadcast %44 : f32 to vector<16x128xf32>
      %50 = arith.mulf %48, %49 : vector<16x128xf32>
      %c0_20 = arith.constant 0 : index
      %c0_21 = arith.constant 0 : index
      %c0_22 = arith.constant 0 : index
      %51 = vector.load %arg5[%c0_20, %c0_21, %c0_22] : memref<1x16x256xf32, #tpu.memory_space<vmem>>, vector<1x16x128xf32>
      %52 = vector.shape_cast %51 : vector<1x16x128xf32> to vector<16x128xf32>
      %53 = vector.shape_cast %50 : vector<16x128xf32> to vector<1x16x128xf32>
      tpu.vector_store %arg5[%c0_20, %c0_21, %c0_22], %53 {strides = array<i32>} : memref<1x16x256xf32, #tpu.memory_space<vmem>>, vector<1x16x128xf32>,
      %c0_23 = arith.constant 0 : index
      %c0_24 = arith.constant 0 : index
      %c128_25 = arith.constant 128 : index
      %54 = vector.load %arg5[%c0_23, %c0_24, %c128_25] : memref<1x16x256xf32, #tpu.memory_space<vmem>>, vector<1x16x128xf32>
      %55 = vector.shape_cast %54 : vector<1x16x128xf32> to vector<16x128xf32>
      %56 = vector.broadcast %42 : f32 to vector<16x128xf32>
      %57 = arith.subf %55, %56 : vector<16x128xf32>
      %58 = vector.broadcast %44 : f32 to vector<16x128xf32>
      %59 = arith.mulf %57, %58 : vector<16x128xf32>
      %c0_26 = arith.constant 0 : index
      %c0_27 = arith.constant 0 : index
      %c128_28 = arith.constant 128 : index
      %60 = vector.load %arg5[%c0_26, %c0_27, %c128_28] : memref<1x16x256xf32, #tpu.memory_space<vmem>>, vector<1x16x128xf32>
      %61 = vector.shape_cast %60 : vector<1x16x128xf32> to vector<16x128xf32>
      %62 = vector.shape_cast %59 : vector<16x128xf32> to vector<1x16x128xf32>
      tpu.vector_store %arg5[%c0_26, %c0_27, %c128_28], %62 {strides = array<i32>} : memref<1x16x256xf32, #tpu.memory_space<vmem>>, vector<1x16x128xf32>,
    } else {
    }
    return
  }
  func.func @transform_0(%arg0: i32, %arg1: i32) -> (i32, i32, i32) {
    %c0_i32 = arith.constant 0 : i32
    %c0_i32_0 = arith.constant 0 : i32
    %c0_i32_1 = arith.constant 0 : i32
    return %arg1, %c0_i32, %c0_i32_0 : i32, i32, i32
  }
  func.func @transform_1(%arg0: i32, %arg1: i32) -> (i32, i32, i32) {
    %c0_i32 = arith.constant 0 : i32
    %c0_i32_0 = arith.constant 0 : i32
    %c0_i32_1 = arith.constant 0 : i32
    return %arg1, %c0_i32, %c0_i32_0 : i32, i32, i32
  }
  func.func @transform_2(%arg0: i32, %arg1: i32) -> (i32, i32, i32) {
    %c0_i32 = arith.constant 0 : i32
    %c0_i32_0 = arith.constant 0 : i32
    %c0_i32_1 = arith.constant 0 : i32
    return %arg0, %c0_i32, %c0_i32_0 : i32, i32, i32
  }
  func.func @transform_3(%arg0: i32, %arg1: i32) -> (i32, i32, i32) {
    %c0_i32 = arith.constant 0 : i32
    %c0_i32_0 = arith.constant 0 : i32
    %c0_i32_1 = arith.constant 0 : i32
    return %arg0, %c0_i32, %c0_i32_0 : i32, i32, i32
  }
}

</mosaic_0001>

<bundles_post_ra>
// kernel: tpu_custom_call.1
= control target key start
LH: loop header
LB: loop body
LE: loop exit
PB: predicated region body
PF: predicated region fallthrough
CT: control target
= control target key end

     0   :  { %s2834_s0 = inlined_call_operand.hbm [shape: bf16[3,16,16], index: 0, kind: input, shape index: {}]   ;;  %s2835_s1 = inlined_call_operand.hbm [shape: bf16[3,128,128], index: 1, kind: input, shape index: {}]   ;;  %s2836_s2 = inlined_call_operand.hbm [shape: bf16[4,16,256], index: 2, kind: input, shape index: {}]   ;;  %s2837_s3 = inlined_call_operand.hbm [shape: f32[4,16,256], index: 3, kind: output, shape index: {}]  }
   0x1   :  { %2847 = sst [smem:[#allocation17_spill]] %s2834_s0 }
   0x2   :  { %2848 = sst [smem:[#allocation18_spill]] %s2835_s1 }
   0x3   :  { %8 = vsyncpa [#allocation4], 0 }
   0x4   :  { %10 = vsyncpa [#allocation4 + $0x1], 0 }
   0x5   :  { %11 = vsyncpa [#allocation7], 0 }
   0x6   :  { %13 = vsyncpa [#allocation7 + $0x1], 0 }
   0x7   :  { %14 = vsyncpa [#allocation5], 0 }
   0x8   :  { %16 = vsyncpa [#allocation5 + $0x1], 0  ;;  %s2358_s12 = smov 0   ;;  %s2360_s13 = smov 0  }
   0x9   :  { %s2362_s14 = smov 0   ;;  %s2364_s15 = smov 0  }
   0xa   :  { %s2366_s16 = smov 0   ;;  %s2368_s17 = smov 0  }
   0xb   :  { %s2370_s18 = smov 0   ;;  %s2372_s19 = smov 0  }
   0xc   :  { %s2374_s20 = smov 0   ;;  %s2376_s21 = smov 0  }
   0xd   :  { %s2378_s22 = smov 0  }
   0xe LB: > { %s2412_s23 = sadd.s32 4294967295, %s2320_s22   ;;  %s31_s24 = sadd.s32 1, %s2312_s20  ;;  %s2320_s22 = sphi %s2378_s22, %s22_s22   ;;  %s2316_s21 = sphi %s2376_s21, %s2885_s21   ;;  %s2312_s20 = sphi %s2374_s20, %s2884_s20   ;;  %s2308_s19 = sphi %s2372_s19, %s2883_s19   ;;  %s2304_s18 = sphi %s2370_s18, %s2882_s18   ;;  %s2300_s17 = sphi %s2368_s17, %s2881_s17   ;;  %s2296_s16 = sphi %s2366_s16, %s2880_s16   ;;  %s2292_s15 = sphi %s2364_s15, %s2879_s15   ;;  %s2288_s14 = sphi %s2362_s14, %s2878_s14   ;;  %s2284_s13 = sphi %s2360_s13, %s2877_s13   ;;  %s2280_s12 = sphi %s2358_s12, %s2876_s12  }
   0xf   : > { %p2415_p0 = scmp.ge.s32.totalorder %s31_s24, 3  ;;  %s41_s26 = sadd.s32 1, %s2300_s17 }
  0x10   : > { %p48_p1 = scmp.ne.s32.totalorder %s2300_s17, %s2296_s16  ;;  %p2841_p2 = scmp.eq.s32.totalorder %s2320_s22, 0 }
  0x11   : > { %s2887_s24 = smov (%p2415_p0, %s31_s24), 0  ;;  %p54_p4 = scmp.ne.s32.totalorder %s2296_s16, %s2292_s15 }
  0x12   : > { %2850 = sst [smem:[#allocation14_spill]] %s2887_s24  ;;  %p50_p3 = por %p2841_p2, %p48_p1 }
  0x13   : > { %s38_s27 = ssub.s32 %s2312_s20, %s2887_s24  ;;  %p2840_p5 = scmp.eq.s32.totalorder %s2412_s23, 0 }
  0x14   : > { %p39_p6 = scmp.eq.s32.totalorder %s38_s27, 0  ;;  %p2839_p8 = scmp.lt.s32.totalorder %s2320_s22, 12 }
  0x15   : > { %p2435_p7 = por %p2840_p5, %p54_p4  ;;  %s2444_s30 = sand.u32 1, %s2300_s17  }
  0x16   : > { %s2441_s29 = scalar_select %p39_p6, %s2300_s17, %s41_s26  }
  0x17   : > { %s2851_s28 = scalar_select %p2435_p7, 1, 0 }
  0x18   : > { %2852 = sst [smem:[#allocation15_spill]] %s2441_s29  ;;  %p2448_p9 = pnand %p2839_p8, %p50_p3 }
  0x19   : > { %s177_s5 = sand.u32 1, %s2320_s22   ;;  %s1569_s6 = sshll.u32 %s2444_s30, 6 }
  0x1a   : > { %s1655_s7 = sshll.u32 %s2312_s20, 10  ;;  %s2854_s1 = sld [smem:[#allocation18_spill]] }
  0x1b   : > { %s181_s11 = scalar_lea.vmem [#allocation6], %s1569_s6  ;;  %s2463_s26 = scalar_lea.sflag [#allocation7], %s177_s5 }
  0x1c   : > { %s188_s15 = sshll.u32 %s181_s11, 4  ;;  %p2102_p12 = pneg %p2448_p9  ;;  %s2460_s15 = int_to_ptr.vmem [resolvable:$true] %s188_s15 }
  0x20   : > { %s2458_s10 = scalar_lea.hbm %s2854_s1, %s1655_s7  ;;  %s2105_s9 = scalar_lea.hbm %s2854_s1, 3072 }
  0x21   : > { %s2100_s27 = scalar_lea.hbm %s2458_s10, 1024  ;;  %p2106_p3 = scmp.lt.u32.totalorder %s2458_s10, %s2854_s1 }
  0x22   : > { %p2101_p11 = scmp.ne.s32.totalorder %s2458_s10, %s2100_s27  ;;  %p2107_p4 = scmp.lt.u32.totalorder %s2105_s9, %s2100_s27 }
  0x23   : > { %p2109_p8 = scmp.lt.u32.totalorder %s2100_s27, %s2458_s10 }
  0x24   : > { %p2103_p13 = pnand %p2102_p12, %p2101_p11  ;;  %p2108_p6 = por %p2107_p4, %p2106_p3 }
  0x26   : > { %p2104_p1 = pneg %p2103_p13  ;;  %p2110_p5 = por %p2109_p8, %p2108_p6 }
  0x28   : > { %p2111_p2 = pnand %p2110_p5, %p2104_p1 }
  0x2a   : > { %2114 = shalt.err (!%p2111_p2)
}
  0x2b   : > { %s2115_s5 = scalar_lea.vmem %s2460_s15, 1024  ;;  %s2322_s11 = smov [#allocation6]  }
  0x2c   : > { %p2116_p11 = scmp.ne.s32.totalorder %s2460_s15, %s2115_s5  ;;  %s2120_s7 = sshll.u32 %s2322_s11, 4  ;;  %s2121_s7 = int_to_ptr.vmem [resolvable:$false] %s2120_s7 }
  0x2d   : > { %s2122_s24 = scalar_lea.vmem %s2121_s7, 2048  ;;  %p2123_p7 = scmp.lt.s32.totalorder %s2460_s15, %s2121_s7 }
  0x2e   : > { %p2118_p13 = pnand %p2116_p11, %p2102_p12  ;;  %p2124_p3 = scmp.lt.s32.totalorder %s2122_s24, %s2115_s5 }
  0x30   : > { %p2119_p10 = pneg %p2118_p13  ;;  %p2125_p4 = por %p2124_p3, %p2123_p7 }
  0x32   : > { %p2126_p8 = pnand %p2125_p4, %p2119_p10 }
  0x34   : > { %2129 = shalt.err (!%p2126_p8)
}
  0x35   : > { %s2843_s27 = smov 64   ;;  %s2844_s8 = smov 4  }
  0x36   : > { %1904 = dma.hbm_to_vmem [thread:$0]  (!%p2448_p9), %s2458_s10, 1024, %s2460_s15, %s2463_s26, %s2843_s27, %s2843_s27, %s2844_s8  }
  0x37   : > { %p217_p2 = scmp.lt.s32.totalorder %s2320_s22, 13  ;;  %p2855_p5 = scmp.ge.s32.totalorder %s2320_s22, 1 }
  0x38   : > { %s1566_s6 = sshll.u32 %s2444_s30, 3  ;;  %s1654_s5 = sshll.u32 %s2312_s20, 7 }
  0x39   : > { %p2497_p7 = pnand %p2855_p5, %p217_p2  ;;  %s2857_s0 = sld [smem:[#allocation17_spill]] }
  0x3a   : > { %s160_s1 = scalar_lea.vmem [#allocation3], %s1566_s6  ;;  %s157_s10 = scalar_lea.sflag [#allocation4], %s2444_s30 }
  0x3b   : > { %s2856_s9 = scalar_select %p2497_p7, 1, 0 }
  0x3c   : > { %s167_s29 = sshll.u32 %s160_s1, 4  ;;  %s2508_s29 = int_to_ptr.vmem [resolvable:$true] %s167_s29 }
  0x3f   : > { %s2506_s24 = scalar_lea.hbm %s2857_s0, %s1654_s5  ;;  %s2135_s5 = scalar_lea.hbm %s2857_s0, 384 }
  0x40   : > { %s2130_s15 = scalar_lea.hbm %s2506_s24, 128  ;;  %p2136_p11 = scmp.lt.u32.totalorder %s2506_s24, %s2857_s0 }
  0x41   : > { %p2131_p10 = scmp.ne.s32.totalorder %s2506_s24, %s2130_s15  ;;  %p2137_p13 = scmp.lt.u32.totalorder %s2135_s5, %s2130_s15 }
  0x42   : > { %p2139_p4 = scmp.lt.u32.totalorder %s2130_s15, %s2506_s24 }
  0x43   : > { %p2133_p1 = pnand %p2131_p10, %p2102_p12  ;;  %p2138_p3 = por %p2137_p13, %p2136_p11 }
  0x45   : > { %p2134_p6 = pneg %p2133_p1  ;;  %p2140_p8 = por %p2139_p4, %p2138_p3 }
  0x47   : > { %p2141_p2 = pnand %p2140_p8, %p2134_p6 }
  0x49   : > { %2144 = shalt.err (!%p2141_p2)
}
  0x4a   : > { %s2145_s1 = scalar_lea.vmem %s2508_s29, 128  ;;  %s2325_s27 = smov [#allocation3]  }
  0x4b   : > { %p2146_p5 = scmp.ne.s32.totalorder %s2508_s29, %s2145_s1  ;;  %s2150_s8 = sshll.u32 %s2325_s27, 4  ;;  %s2151_s8 = int_to_ptr.vmem [resolvable:$false] %s2150_s8 }
  0x4c   : > { %s2152_s6 = scalar_lea.vmem %s2151_s8, 256  ;;  %p2153_p7 = scmp.lt.s32.totalorder %s2508_s29, %s2151_s8 }
  0x4d   : > { %p2148_p10 = pnand %p2146_p5, %p2102_p12  ;;  %p2154_p11 = scmp.lt.s32.totalorder %s2152_s6, %s2145_s1 }
  0x4f   : > { %p2149_p1 = pneg %p2148_p10  ;;  %p2155_p13 = por %p2154_p11, %p2153_p7 }
  0x51   : > { %p2156_p3 = pnand %p2155_p13, %p2149_p1 }
  0x53   : > { %2159 = shalt.err (!%p2156_p3)
}
  0x54   : > { %s2858_s15 = smov 4   ;;  %s2859_s5 = smov 64  }
  0x55   : > { %1901 = dma.hbm_to_vmem [thread:$0]  (!%p2448_p9), %s2506_s24, 128, %s2508_s29, %s157_s10, %s2859_s5, %s2859_s5, %s2858_s15  }
  0x56   : > { %s1563_s4 = sadd.s32 4294967294, %s2320_s22   ;;  %s34_s11 = sadd.s32 1, %s2316_s21 }
  0x57   : > { %s93_s30 = sadd.s32 1, %s2288_s14  ;;  %s2889_s11 = smov (!%p2415_p0, %s34_s11), %s2316_s21 }
  0x58   : > { %p100_p12 = scmp.ne.s32.totalorder %s2288_s14, %s2284_s13  ;;  %p106_p7 = scmp.ne.s32.totalorder %s2284_s13, %s2280_s12 }
  0x59   : > { %p36_p6 = scmp.ge.s32.totalorder %s2889_s11, 4  ;;  %p130_p4 = scmp.eq.s32.totalorder %s2412_s23, 11 }
  0x5a   : > { %p2860_p8 = scmp.eq.s32.totalorder %s2320_s22, 0  ;;  %p2862_p5 = scmp.eq.s32.totalorder %s2412_s23, 0 }
  0x5b   : > { %s2891_s11 = smov (%p36_p6, %s2889_s11), 0  ;;  %p2564_p0 = por %p130_p4, %p100_p12 }
  0x5c   : > { %p2552_p2 = por %p100_p12, %p2860_p8  ;;  %p2558_p9 = por %p106_p7, %p2862_p5 }
  0x5d   : > { %2864 = sst [smem:[#allocation16_spill]] %s2891_s11  ;;  %p136_p10 = scmp.eq.s32.totalorder %s1563_s4, 11 }
  0x5e   : > { %s2865_s25 = scalar_select %p2564_p0, 1, 0 }
  0x5f   : > { %s90_s24 = ssub.s32 %s2316_s21, %s2891_s11  ;;  %s200_s10 = sand.u32 1, %s2288_s14  }
  0x60   : > { %p91_p1 = scmp.eq.s32.totalorder %s90_s24, 0  ;;  %p2571_p11 = por %p136_p10, %p106_p7 }
  0x61   : > { %s1572_s27 = sshll.u32 %s200_s10, 4  ;;  %s1656_s8 = sshll.u32 %s2316_s21, 8 }
  0x62   : > { %s2866_s1 = scalar_select %p2571_p11, 1, 0 }
  0x63   : > { %s2577_s6 = scalar_select %p91_p1, %s2288_s14, %s93_s30  }
  0x64   : > { %s2582_s0 = scalar_lea.hbm %s2836_s2, %s1656_s8  ;;  %s202_s4 = scalar_lea.vmem [#allocation8], %s1572_s27 }
  0x65   : > { %s209_s11 = sshll.u32 %s202_s4, 4  ;;  %p2867_p13 = scmp.lt.s32.totalorder %s2320_s22, 12  ;;  %s2592_s11 = int_to_ptr.vmem [resolvable:$true] %s209_s11 }
  0x66   : > { %s2160_s30 = scalar_lea.hbm %s2582_s0, 256  ;;  %s2165_s7 = scalar_lea.hbm %s2836_s2, 1024 }
  0x67   : > { %p2588_p3 = pnand %p2867_p13, %p2552_p2  ;;  %p2161_p12 = scmp.ne.s32.totalorder %s2582_s0, %s2160_s30 }
  0x68   : > { %p2166_p8 = scmp.lt.u32.totalorder %s2582_s0, %s2836_s2  ;;  %p2167_p2 = scmp.lt.u32.totalorder %s2165_s7, %s2160_s30 }
  0x69   : > { %p2162_p7 = pneg %p2588_p3  ;;  %p2169_p10 = scmp.lt.u32.totalorder %s2160_s30, %s2582_s0 }
  0x6a   : > { %p2168_p5 = por %p2167_p2, %p2166_p8 }
  0x6b   : > { %p2163_p6 = pnand %p2162_p7, %p2161_p12 }
  0x6c   : > { %p2170_p1 = por %p2169_p10, %p2168_p5 }
  0x6d   : > { %p2164_p4 = pneg %p2163_p6 }
  0x6f   : > { %p2171_p13 = pnand %p2170_p1, %p2164_p4 }
  0x71   : > { %2174 = shalt.err (!%p2171_p13)
}
  0x72   : > { %s2175_s5 = scalar_lea.vmem %s2592_s11, 256  ;;  %s2326_s4 = smov [#allocation8]  }
  0x73   : > { %p2176_p12 = scmp.ne.s32.totalorder %s2592_s11, %s2175_s5  ;;  %s2180_s10 = sshll.u32 %s2326_s4, 4  ;;  %s2181_s10 = int_to_ptr.vmem [resolvable:$false] %s2180_s10 }
  0x74   : > { %s2182_s27 = scalar_lea.vmem %s2181_s10, 512  ;;  %p2183_p0 = scmp.lt.s32.totalorder %s2592_s11, %s2181_s10 }
  0x75   : > { %p2178_p6 = pnand %p2176_p12, %p2162_p7  ;;  %p2184_p8 = scmp.lt.s32.totalorder %s2182_s27, %s2175_s5 }
  0x77   : > { %p2179_p11 = pneg %p2178_p6  ;;  %p2185_p2 = por %p2184_p8, %p2183_p0 }
  0x79   : > { %p2186_p5 = pnand %p2185_p2, %p2179_p11 }
  0x7b   : > { %2189 = shalt.err (!%p2186_p5)
}
  0x7c   : > { %s2327_s30 = smov 128   ;;  %s2328_s7 = smov 8  }
  0x7d   : > { %1907 = dma.hbm_to_vmem [thread:$0]  (!%p2588_p3), %s2582_s0, 256, %s2592_s11, %s2463_s26, %s2327_s30, %s2327_s30, %s2328_s7  }
  0x7e   : > { %p2869_p7 = scmp.ne.s32.totalorder %s2856_s9, 0 }
  0x7f   : > { %s223_s8 = sand.u32 (!%p2869_p7), 1, %s2296_s16   ;;  %p2870_p0 = scmp.ne.s32.totalorder (!%p2869_p7), %s2851_s28, 0 }
  0x80   : > { %221 = sbr.rel (%p2869_p7) target bundleno = 1817 (0x719), region = 32  ;;  %s1576_s15 = sshll.u32 (!%p2869_p7), %s223_s8, 3 }
  0x81   : > { %s224_s4 = scalar_lea.sflag (!%p2869_p7), [#allocation4], %s223_s8  ;;  %s2623_s5 = scalar_lea.vmem (!%p2869_p7), [#allocation3], %s1576_s15 }
  0x87   : > { %2263 = dma.done.wait (%p2870_p0), %s224_s4, 128  }
  0x88   : > { %2265 = vsyncadd (%p2870_p0), %s224_s4, 4294967168  ;;  %s232_s10 = sand.u32 1, %s2412_s23   ;;  %s1577_s24 = sshll.u32 %s223_s8, 6 }
  0x89   : > { %s233_s0 = scalar_lea.sflag [#allocation7], %s232_s10  ;;  %s2630_s26 = scalar_lea.vmem [#allocation6], %s1577_s24 }
  0x8a   : > { %2267 = dma.done.wait (%p2870_p0), %s233_s0, 1024  }
  0x8b   : > { %2269 = vsyncadd (%p2870_p0), %s233_s0, 4294966272  ;;  %s2637_s9 = sand.u32 1, %s2284_s13  }
  0x8c   : > { %s1578_s11 = sshll.u32 %s2637_s9, 4 }
  0x8d   : > { %s2640_s27 = scalar_lea.vmem [#allocation8], %s1578_s11 }
  0x8e   : > { %2271 = dma.done.wait (%p2558_p9), %s233_s0, 256  }
  0x8f   : > { %2273 = vsyncadd (%p2558_p9), %s233_s0, 4294967040  ;;  %s1579_s23 = sshll.u32 %s2637_s9, 5  ;;  %p1580_p11 = scmp.ne.s32.totalorder %s2304_s18, 0 }
  0x90   : > { %s2647_s30 = scalar_lea.vmem [#allocation9], %s1579_s23  ;;  %v2329_v0 = vmov (!%p1580_p11), 0.0   ;;  %v2014_v1 = vld [vmem:[%s2640_s27] ss:$8 sps:$4 sm:$0xff] (!%p1580_p11)   ;;  %vm2330_vm0 = vmmov (!%p1580_p11), 0   ;;  %vm298_vm1 = vcmask (!%p1580_p11), 130048  }
  0x91   : > { %282 = sbr.rel (%p1580_p11) target bundleno = 598 (0x256), region = 48  ;;  %1724 = vmatprep.subr.bf16.mxu1 (!%p1580_p11), %v2329_v0  ;;  %1726 = vmatprep.mubr.msk.bf16.mxu1 (!%p1580_p11), %vm2330_vm0, %v2329_v0  ;;  %v2015_v2 = vld [vmem:[%s2623_s5] sm:$0xff] (!%p1580_p11)   ;;  %v2018_v5 = vld [vmem:[%s2630_s26] sm:$0xff] (!%p1580_p11)   ;;  %v2019_v6 = vld [vmem:[%s2630_s26 + $0x8] sm:$0xff] (!%p1580_p11)  }
  0x92   : > { %1750 = vmatprep.subr.bf16.mxu0 (!%p1580_p11), %v2329_v0  ;;  %1752 = vmatprep.mubr.msk.bf16.mxu0 (!%p1580_p11), %vm2330_vm0, %v2329_v0  ;;  %v2016_v3 = vld [vmem:[%s2640_s27 + $0x4] ss:$8 sps:$4 sm:$0xff] (!%p1580_p11)  }
  0x93   : > { %1725 = vmatpush3.bf16.msra.mxu1 (!%p1580_p11), %v2014_v1  ;;  %v2017_v4 = vld [vmem:[%s2623_s5] sm:$0xff] (!%p1580_p11)   ;;  %1751 = vmatpush3.bf16.msra.mxu0 (!%p1580_p11), %v2016_v3  ;;  %v2021_v7 = vld [vmem:[%s2630_s26] sm:$0xff] (!%p1580_p11)   ;;  %v2023_v8 = vld [vmem:[%s2630_s26 + $0x8] sm:$0xff] (!%p1580_p11)  }
  0x94   : > { %1730 = vmatprep.subr.bf16.mxu1 (!%p1580_p11), %v2329_v0  ;;  %1756 = vmatprep.subr.bf16.mxu0 (!%p1580_p11), %v2329_v0  ;;  %v2020_v9 = vld [vmem:[%s2630_s26 + $0x10] sm:$0xff] (!%p1580_p11)   ;;  %v2022_v11 = vld [vmem:[%s2630_s26 + $0x18] sm:$0xff] (!%p1580_p11)   ;;  %v2024_v12 = vld [vmem:[%s2630_s26 + $0x20] sm:$0xff] (!%p1580_p11)  }
  0x95   : > { %v2025_v10 = vld [vmem:[%s2630_s26 + $0x10] sm:$0xff] (!%p1580_p11)   ;;  %v2027_v13 = vld [vmem:[%s2630_s26 + $0x18] sm:$0xff] (!%p1580_p11)   ;;  %v2029_v14 = vld [vmem:[%s2630_s26 + $0x20] sm:$0xff] (!%p1580_p11)  }
  0x96   : > { %1727 = vmatmul.mubr.msk.bf16.vlgmr.msra.gmra.mrb[0].mxu1 (!%p1580_p11), %vm298_vm1, %v2015_v2  ;;  %1753 = vmatmul.mubr.msk.bf16.vlgmr.msra.gmra.mrb[0].mxu0 (!%p1580_p11), %vm298_vm1, %v2017_v4  ;;  %v2026_v15 = vld [vmem:[%s2630_s26 + $0x28] sm:$0xff] (!%p1580_p11)   ;;  %v2028_v17 = vld [vmem:[%s2630_s26 + $0x30] sm:$0xff] (!%p1580_p11)   ;;  %v2030_v19 = vld [vmem:[%s2630_s26 + $0x38] sm:$0xff] (!%p1580_p11)  }
  0x97   : > { %1731 = vmatpush3.bf16.msra.mxu1 (!%p1580_p11), %v2018_v5  ;;  %1746 = vmatprep.mubr.msk.bf16.mxu1 (!%p1580_p11), %vm2330_vm0, %v2329_v0  ;;  %v2031_v16 = vld [vmem:[%s2630_s26 + $0x28] sm:$0xff] (!%p1580_p11)   ;;  %v2032_v18 = vld [vmem:[%s2630_s26 + $0x30] sm:$0xff] (!%p1580_p11)   ;;  %v2033_v20 = vld [vmem:[%s2630_s26 + $0x38] sm:$0xff] (!%p1580_p11)  }
  0x98   : > { %1732 = vmatprep.subr.bf16.mxu1 %v2329_v0  ;;  %1772 = vmatprep.mubr.msk.bf16.mxu0 %vm2330_vm0, %v2329_v0 }
  0x99   : > { %1757 = vmatpush3.bf16.msra.mxu0 %v2021_v7 }
  0x9a   : > { %1758 = vmatprep.subr.bf16.mxu0 %v2329_v0 }
  0x9b   : > { %1733 = vmatpush3.bf16.msra.mxu1 %v2019_v6 }
  0x9c   : > { %1734 = vmatprep.subr.bf16.mxu1 %v2329_v0 }
  0x9d   : > { %1759 = vmatpush3.bf16.msra.mxu0 %v2023_v8 }
  0x9e   : > { %1760 = vmatprep.subr.bf16.mxu0 %v2329_v0 }
  0x9f   : > { %1735 = vmatpush3.bf16.msra.mxu1 %v2020_v9 }
  0xa0   : > { %1736 = vmatprep.subr.bf16.mxu1 %v2329_v0 }
  0xa1   : > { %1761 = vmatpush3.bf16.msra.mxu0 %v2025_v10 }
  0xa2   : > { %1762 = vmatprep.subr.bf16.mxu0 %v2329_v0 }
  0xa3   : > { %1737 = vmatpush3.bf16.msra.mxu1 %v2022_v11 }
  0xa4   : > { %1738 = vmatprep.subr.bf16.mxu1 %v2329_v0 }
  0xa5   : > { %1763 = vmatpush3.bf16.msra.mxu0 %v2027_v13 }
  0xa6   : > { %1764 = vmatprep.subr.bf16.mxu0 %v2329_v0 }
  0xa7   : > { %1739 = vmatpush3.bf16.msra.mxu1 %v2024_v12 }
  0xa8   : > { %1740 = vmatprep.subr.bf16.mxu1 %v2329_v0 }
  0xa9   : > { %1765 = vmatpush3.bf16.msra.mxu0 %v2029_v14 }
  0xaa   : > { %1766 = vmatprep.subr.bf16.mxu0 %v2329_v0 }
  0xab   : > { %1741 = vmatpush3.bf16.msra.mxu1 %v2026_v15 }
  0xac   : > { %1742 = vmatprep.subr.bf16.mxu1 %v2329_v0 }
  0xad   : > { %1767 = vmatpush3.bf16.msra.mxu0 %v2031_v16 }
  0xae   : > { %1768 = vmatprep.subr.bf16.mxu0 %v2329_v0 }
  0xaf   : > { %1743 = vmatpush3.bf16.msra.mxu1 %v2028_v17 }
  0xb0   : > { %1744 = vmatprep.subr.bf16.mxu1 %v2329_v0 }
  0xb1   : > { %1769 = vmatpush3.bf16.msra.mxu0 %v2032_v18 }
  0xb2   : > { %1770 = vmatprep.subr.bf16.mxu0 %v2329_v0 }
  0xb3   : > { %1745 = vmatpush3.bf16.msra.mxu1 %v2030_v19 }
  0xb5   : > { %1771 = vmatpush3.bf16.msra.mxu0 %v2033_v20 }
 0x169   : > { %v336_v21 = vpop.f32.mrb[0].mxu1  ;;  %v509_v24 = vpop.f32.mrb[0].mxu0 }
 0x16a   : > { %v1728_v22 = vpop.f32.mrb[1].mxu1  ;;  %v1754_v27 = vpop.f32.mrb[1].mxu0 }
 0x16b   : > { %v339_v23 = vpop.f32.mrb[2].mxu1  ;;  %v512_v28 = vpop.f32.mrb[2].mxu0 }
 0x16c   : > { %v343_v25 = vpack.c.bf16 %v339_v23, %v336_v21  ;;  %v1729_v26 = vpop.f32.mrb[3].mxu1  ;;  %v516_v29 = vpack.c.bf16 %v512_v28, %v509_v24  ;;  %v1755_v30 = vpop.f32.mrb[3].mxu0 }
 0x16e   : > { %1747 = vmatmul.mubr.bf16.vlgmr.msra.gmra.mrb[4].mxu1 %v343_v25  ;;  %1773 = vmatmul.mubr.bf16.vlgmr.msra.gmra.mrb[4].mxu0 %v516_v29 }
 0x241   : > { %v444_v31 = vpop.f32.mrb[4].mxu1  ;;  %v617_v35 = vpop.f32.mrb[4].mxu0 }
 0x242   : > { %v445_v32 = vadd.f32 1.0, %v444_v31  ;;  %v1748_v33 = vpop.f32.mrb[5].mxu1  ;;  %v618_v38 = vadd.f32 1.0, %v617_v35  ;;  %v1774_v39 = vpop.f32.mrb[5].mxu0 }
 0x243   : > { %v447_v34 = vpop.f32.mrb[6].mxu1  ;;  %v620_v40 = vpop.f32.mrb[6].mxu0 }
 0x244   : > { %2034 = vlog2.f32 %v445_v32  ;;  %v448_v36 = vadd.f32 1.0, %v447_v34  ;;  %v1749_v37 = vpop.f32.mrb[7].mxu1  ;;  %v621_v41 = vadd.f32 1.0, %v620_v40  ;;  %v1775_v42 = vpop.f32.mrb[7].mxu0 }
 0x246   : > { %2036 = vlog2.f32 %v448_v36 }
 0x247   : > { %2038 = vlog2.f32 %v618_v38 }
 0x248   : > { %2040 = vlog2.f32 %v621_v41 }
 0x24e   : > { %v2035_v43 = vpop.eup %2034 }
 0x24f   : > { %v452_v44 = vmul.f32 0.6931472, %v2035_v43 }
 0x250   : > { %v2037_v45 = vpop.eup %2036 }
 0x251   : > { %v2039_v46 = vpop.eup %2038  ;;  %455 = vst [vmem:[%s2647_s30] sm:$0xff] %v452_v44  ;;  %v454_v47 = vmul.f32 0.6931472, %v2037_v45 }
 0x252   : > { %v2041_v48 = vpop.eup %2040  ;;  %v625_v49 = vmul.f32 0.6931472, %v2039_v46 }
 0x253   : > { %456 = vst [vmem:[%s2647_s30 + $0x10] sm:$0xff] %v454_v47  ;;  %v627_v50 = vmul.f32 0.6931472, %v2041_v48 }
 0x254   : > { %628 = vst [vmem:[%s2647_s30 + $0x8] sm:$0xff] %v625_v49 }
 0x255   : > { %629 = vst [vmem:[%s2647_s30 + $0x18] sm:$0xff] %v627_v50 }
 0x256 PF: > { %p1603_p9 = scmp.ne.s32.totalorder %s2304_s18, 1 }
 0x257   : > { %v2331_v51 = vmov (!%p1603_p9), 0.0   ;;  %v2042_v52 = vld [vmem:[%s2640_s27] ss:$8 sps:$4 sm:$0xff] (!%p1603_p9)   ;;  %vm2332_vm2 = vmmov (!%p1603_p9), 0   ;;  %vm649_vm3 = vcmask (!%p1603_p9), 130048  }
 0x258   : > { %633 = sbr.rel (%p1603_p9) target bundleno = 1055 (0x41f), region = 52  ;;  %1776 = vmatprep.subr.bf16.mxu1 (!%p1603_p9), %v2331_v51  ;;  %1778 = vmatprep.mubr.msk.bf16.mxu1 (!%p1603_p9), %vm2332_vm2, %v2331_v51  ;;  %v2043_v53 = vld [vmem:[%s2623_s5] sm:$0xff] (!%p1603_p9)   ;;  %v2046_v56 = vld [vmem:[%s2630_s26] sm:$0xff] (!%p1603_p9)   ;;  %v2047_v57 = vld [vmem:[%s2630_s26 + $0x8] sm:$0xff] (!%p1603_p9)  }
 0x259   : > { %1802 = vmatprep.subr.bf16.mxu0 (!%p1603_p9), %v2331_v51  ;;  %1804 = vmatprep.mubr.msk.bf16.mxu0 (!%p1603_p9), %vm2332_vm2, %v2331_v51  ;;  %v2044_v54 = vld [vmem:[%s2640_s27 + $0x4] ss:$8 sps:$4 sm:$0xff] (!%p1603_p9)  }
 0x25a   : > { %1777 = vmatpush3.bf16.msra.mxu1 (!%p1603_p9), %v2042_v52  ;;  %v2045_v55 = vld [vmem:[%s2623_s5] sm:$0xff] (!%p1603_p9)   ;;  %1803 = vmatpush3.bf16.msra.mxu0 (!%p1603_p9), %v2044_v54  ;;  %v2049_v58 = vld [vmem:[%s2630_s26] sm:$0xff] (!%p1603_p9)   ;;  %v2051_v59 = vld [vmem:[%s2630_s26 + $0x8] sm:$0xff] (!%p1603_p9)  }
 0x25b   : > { %1782 = vmatprep.subr.bf16.mxu1 (!%p1603_p9), %v2331_v51  ;;  %1808 = vmatprep.subr.bf16.mxu0 (!%p1603_p9), %v2331_v51  ;;  %v2048_v60 = vld [vmem:[%s2630_s26 + $0x10] sm:$0xff] (!%p1603_p9)   ;;  %v2050_v62 = vld [vmem:[%s2630_s26 + $0x18] sm:$0xff] (!%p1603_p9)   ;;  %v2052_v63 = vld [vmem:[%s2630_s26 + $0x20] sm:$0xff] (!%p1603_p9)  }
 0x25c   : > { %v2053_v61 = vld [vmem:[%s2630_s26 + $0x10] sm:$0xff] (!%p1603_p9)   ;;  %v2055_v0 = vld [vmem:[%s2630_s26 + $0x18] sm:$0xff] (!%p1603_p9)   ;;  %v2057_v1 = vld [vmem:[%s2630_s26 + $0x20] sm:$0xff] (!%p1603_p9)  }
 0x25d   : > { %1779 = vmatmul.mubr.msk.bf16.vlgmr.msra.gmra.mrb[0].mxu1 (!%p1603_p9), %vm649_vm3, %v2043_v53  ;;  %1805 = vmatmul.mubr.msk.bf16.vlgmr.msra.gmra.mrb[0].mxu0 (!%p1603_p9), %vm649_vm3, %v2045_v55  ;;  %v2054_v2 = vld [vmem:[%s2630_s26 + $0x28] sm:$0xff] (!%p1603_p9)   ;;  %v2056_v4 = vld [vmem:[%s2630_s26 + $0x30] sm:$0xff] (!%p1603_p9)   ;;  %v2058_v6 = vld [vmem:[%s2630_s26 + $0x38] sm:$0xff] (!%p1603_p9)  }
 0x25e   : > { %1783 = vmatpush3.bf16.msra.mxu1 (!%p1603_p9), %v2046_v56  ;;  %1798 = vmatprep.mubr.msk.bf16.mxu1 (!%p1603_p9), %vm2332_vm2, %v2331_v51  ;;  %v2059_v3 = vld [vmem:[%s2630_s26 + $0x28] sm:$0xff] (!%p1603_p9)   ;;  %v2060_v5 = vld [vmem:[%s2630_s26 + $0x30] sm:$0xff] (!%p1603_p9)   ;;  %v2061_v7 = vld [vmem:[%s2630_s26 + $0x38] sm:$0xff] (!%p1603_p9)  }
 0x25f   : > { %1784 = vmatprep.subr.bf16.mxu1 %v2331_v51  ;;  %1824 = vmatprep.mubr.msk.bf16.mxu0 %vm2332_vm2, %v2331_v51  ;;  %v806_v31 = vld [vmem:[%s2647_s30] sm:$0xff]  ;;  %v807_v34 = vld [vmem:[%s2647_s30 + $0x10] sm:$0xff]  ;;  %v983_v38 = vld [vmem:[%s2647_s30 + $0x8] sm:$0xff] }
 0x260   : > { %1809 = vmatpush3.bf16.msra.mxu0 %v2049_v58  ;;  %v984_v41 = vld [vmem:[%s2647_s30 + $0x18] sm:$0xff] }
 0x261   : > { %1810 = vmatprep.subr.bf16.mxu0 %v2331_v51 }
 0x262   : > { %1785 = vmatpush3.bf16.msra.mxu1 %v2047_v57 }
 0x263   : > { %1786 = vmatprep.subr.bf16.mxu1 %v2331_v51 }
 0x264   : > { %1811 = vmatpush3.bf16.msra.mxu0 %v2051_v59 }
 0x265   : > { %1812 = vmatprep.subr.bf16.mxu0 %v2331_v51 }
 0x266   : > { %1787 = vmatpush3.bf16.msra.mxu1 %v2048_v60 }
 0x267   : > { %1788 = vmatprep.subr.bf16.mxu1 %v2331_v51 }
 0x268   : > { %1813 = vmatpush3.bf16.msra.mxu0 %v2053_v61 }
 0x269   : > { %1814 = vmatprep.subr.bf16.mxu0 %v2331_v51 }
 0x26a   : > { %1789 = vmatpush3.bf16.msra.mxu1 %v2050_v62 }
 0x26b   : > { %1790 = vmatprep.subr.bf16.mxu1 %v2331_v51 }
 0x26c   : > { %1815 = vmatpush3.bf16.msra.mxu0 %v2055_v0 }
 0x26d   : > { %1816 = vmatprep.subr.bf16.mxu0 %v2331_v51 }
 0x26e   : > { %1791 = vmatpush3.bf16.msra.mxu1 %v2052_v63 }
 0x26f   : > { %1792 = vmatprep.subr.bf16.mxu1 %v2331_v51 }
 0x270   : > { %1817 = vmatpush3.bf16.msra.mxu0 %v2057_v1 }
 0x271   : > { %1818 = vmatprep.subr.bf16.mxu0 %v2331_v51 }
 0x272   : > { %1793 = vmatpush3.bf16.msra.mxu1 %v2054_v2 }
 0x273   : > { %1794 = vmatprep.subr.bf16.mxu1 %v2331_v51 }
 0x274   : > { %1819 = vmatpush3.bf16.msra.mxu0 %v2059_v3 }
 0x275   : > { %1820 = vmatprep.subr.bf16.mxu0 %v2331_v51 }
 0x276   : > { %1795 = vmatpush3.bf16.msra.mxu1 %v2056_v4 }
 0x277   : > { %1796 = vmatprep.subr.bf16.mxu1 %v2331_v51 }
 0x278   : > { %1821 = vmatpush3.bf16.msra.mxu0 %v2060_v5 }
 0x279   : > { %1822 = vmatprep.subr.bf16.mxu0 %v2331_v51 }
 0x27a   : > { %1797 = vmatpush3.bf16.msra.mxu1 %v2058_v6 }
 0x27c   : > { %1823 = vmatpush3.bf16.msra.mxu0 %v2061_v7 }
 0x330   : > { %v687_v8 = vpop.f32.mrb[0].mxu1  ;;  %v864_v11 = vpop.f32.mrb[0].mxu0 }
 0x331   : > { %v1780_v9 = vpop.f32.mrb[1].mxu1  ;;  %v1806_v14 = vpop.f32.mrb[1].mxu0 }
 0x332   : > { %v690_v10 = vpop.f32.mrb[2].mxu1  ;;  %v867_v15 = vpop.f32.mrb[2].mxu0 }
 0x333   : > { %v694_v12 = vpack.c.bf16 %v690_v10, %v687_v8  ;;  %v1781_v13 = vpop.f32.mrb[3].mxu1  ;;  %v871_v16 = vpack.c.bf16 %v867_v15, %v864_v11  ;;  %v1807_v17 = vpop.f32.mrb[3].mxu0 }
 0x335   : > { %1799 = vmatmul.mubr.bf16.vlgmr.msra.gmra.mrb[4].mxu1 %v694_v12  ;;  %1825 = vmatmul.mubr.bf16.vlgmr.msra.gmra.mrb[4].mxu0 %v871_v16 }
 0x408   : > { %v795_v18 = vpop.f32.mrb[4].mxu1  ;;  %v972_v22 = vpop.f32.mrb[4].mxu0 }
 0x409   : > { %v796_v19 = vadd.f32 1.0, %v795_v18  ;;  %v1800_v20 = vpop.f32.mrb[5].mxu1  ;;  %v973_v25 = vadd.f32 1.0, %v972_v22  ;;  %v1826_v26 = vpop.f32.mrb[5].mxu0 }
 0x40a   : > { %v798_v21 = vpop.f32.mrb[6].mxu1  ;;  %v975_v27 = vpop.f32.mrb[6].mxu0 }
 0x40b   : > { %2062 = vlog2.f32 %v796_v19  ;;  %v799_v23 = vadd.f32 1.0, %v798_v21  ;;  %v1801_v24 = vpop.f32.mrb[7].mxu1  ;;  %v976_v28 = vadd.f32 1.0, %v975_v27  ;;  %v1827_v29 = vpop.f32.mrb[7].mxu0 }
 0x40d   : > { %2064 = vlog2.f32 %v799_v23 }
 0x40e   : > { %2066 = vlog2.f32 %v973_v25 }
 0x40f   : > { %2068 = vlog2.f32 %v976_v28 }
 0x415   : > { %v2063_v30 = vpop.eup %2062 }
 0x416   : > { %v803_v32 = vmul.f32 0.6931472, %v2063_v30 }
 0x417   : > { %v2065_v33 = vpop.eup %2064 }
 0x418   : > { %v2067_v35 = vpop.eup %2066  ;;  %v808_v36 = vadd.f32 %v806_v31, %v803_v32  ;;  %v805_v37 = vmul.f32 0.6931472, %v2065_v33 }
 0x419   : > { %v2069_v39 = vpop.eup %2068  ;;  %v980_v40 = vmul.f32 0.6931472, %v2067_v35 }
 0x41a   : > { %810 = vst [vmem:[%s2647_s30] sm:$0xff] %v808_v36  ;;  %v809_v42 = vadd.f32 %v807_v34, %v805_v37  ;;  %v982_v43 = vmul.f32 0.6931472, %v2069_v39 }
 0x41b   : > { %v985_v44 = vadd.f32 %v983_v38, %v980_v40 }
 0x41c   : > { %811 = vst [vmem:[%s2647_s30 + $0x10] sm:$0xff] %v809_v42  ;;  %v986_v45 = vadd.f32 %v984_v41, %v982_v43 }
 0x41d   : > { %987 = vst [vmem:[%s2647_s30 + $0x8] sm:$0xff] %v985_v44 }
 0x41e   : > { %988 = vst [vmem:[%s2647_s30 + $0x18] sm:$0xff] %v986_v45 }
 0x41f PF: > { %p1626_p3 = scmp.ne.s32.totalorder %s2304_s18, 2 }
 0x420   : > { %v2333_v46 = vmov (!%p1626_p3), 0.0   ;;  %v2070_v47 = vld [vmem:[%s2640_s27] ss:$8 sps:$4 sm:$0xff] (!%p1626_p3)   ;;  %vm2334_vm4 = vmmov (!%p1626_p3), 0   ;;  %vm1008_vm5 = vcmask (!%p1626_p3), 130048   ;;  %v1348_v25 = vlaneseq (!%p1626_p3) }
 0x421   : > { %992 = sbr.rel (%p1626_p3) target bundleno = 1791 (0x6ff), region = 56  ;;  %1828 = vmatprep.subr.bf16.mxu1 (!%p1626_p3), %v2333_v46  ;;  %1830 = vmatprep.mubr.msk.bf16.mxu1 (!%p1626_p3), %vm2334_vm4, %v2333_v46  ;;  %v2071_v48 = vld [vmem:[%s2623_s5] sm:$0xff] (!%p1626_p3)   ;;  %v2074_v51 = vld [vmem:[%s2630_s26] sm:$0xff] (!%p1626_p3)   ;;  %v2075_v52 = vld [vmem:[%s2630_s26 + $0x8] sm:$0xff] (!%p1626_p3)  }
 0x422   : > { %1854 = vmatprep.subr.bf16.mxu0 (!%p1626_p3), %v2333_v46  ;;  %1856 = vmatprep.mubr.msk.bf16.mxu0 (!%p1626_p3), %vm2334_vm4, %v2333_v46  ;;  %v2072_v49 = vld [vmem:[%s2640_s27 + $0x4] ss:$8 sps:$4 sm:$0xff] (!%p1626_p3)   ;;  %v1349_v33 = vand.u32 (!%p1626_p3), 127, %v1348_v25 }
 0x423   : > { %1829 = vmatpush3.bf16.msra.mxu1 (!%p1626_p3), %v2070_v47  ;;  %v2073_v50 = vld [vmem:[%s2623_s5] sm:$0xff] (!%p1626_p3)   ;;  %1855 = vmatpush3.bf16.msra.mxu0 (!%p1626_p3), %v2072_v49  ;;  %v2077_v53 = vld [vmem:[%s2630_s26] sm:$0xff] (!%p1626_p3)   ;;  %v2079_v54 = vld [vmem:[%s2630_s26 + $0x8] sm:$0xff] (!%p1626_p3)  }
 0x424   : > { %1834 = vmatprep.subr.bf16.mxu1 (!%p1626_p3), %v2333_v46  ;;  %1860 = vmatprep.subr.bf16.mxu0 (!%p1626_p3), %v2333_v46  ;;  %v2076_v55 = vld [vmem:[%s2630_s26 + $0x10] sm:$0xff] (!%p1626_p3)   ;;  %v2078_v57 = vld [vmem:[%s2630_s26 + $0x18] sm:$0xff] (!%p1626_p3)   ;;  %v2080_v58 = vld [vmem:[%s2630_s26 + $0x20] sm:$0xff] (!%p1626_p3)   ;;  %vm1350_vm6 = vcmp.lt.s32.totalorder (!%p1626_p3), %v1349_v33, 16 }
 0x425   : > { %v2081_v56 = vld [vmem:[%s2630_s26 + $0x10] sm:$0xff] (!%p1626_p3)   ;;  %v2083_v59 = vld [vmem:[%s2630_s26 + $0x18] sm:$0xff] (!%p1626_p3)   ;;  %v2085_v60 = vld [vmem:[%s2630_s26 + $0x20] sm:$0xff] (!%p1626_p3)  }
 0x426   : > { %1831 = vmatmul.mubr.msk.bf16.vlgmr.msra.gmra.mrb[0].mxu1 (!%p1626_p3), %vm1008_vm5, %v2071_v48  ;;  %1857 = vmatmul.mubr.msk.bf16.vlgmr.msra.gmra.mrb[0].mxu0 (!%p1626_p3), %vm1008_vm5, %v2073_v50  ;;  %v2082_v61 = vld [vmem:[%s2630_s26 + $0x28] sm:$0xff] (!%p1626_p3)   ;;  %v2084_v63 = vld [vmem:[%s2630_s26 + $0x30] sm:$0xff] (!%p1626_p3)   ;;  %v2086_v1 = vld [vmem:[%s2630_s26 + $0x38] sm:$0xff] (!%p1626_p3)  }
 0x427   : > { %1835 = vmatpush3.bf16.msra.mxu1 (!%p1626_p3), %v2074_v51  ;;  %1850 = vmatprep.mubr.msk.bf16.mxu1 (!%p1626_p3), %vm2334_vm4, %v2333_v46  ;;  %v2087_v62 = vld [vmem:[%s2630_s26 + $0x28] sm:$0xff] (!%p1626_p3)   ;;  %v2088_v0 = vld [vmem:[%s2630_s26 + $0x30] sm:$0xff] (!%p1626_p3)   ;;  %v2089_v2 = vld [vmem:[%s2630_s26 + $0x38] sm:$0xff] (!%p1626_p3)  }
 0x428   : > { %1836 = vmatprep.subr.bf16.mxu1 %v2333_v46  ;;  %1876 = vmatprep.mubr.msk.bf16.mxu0 %vm2334_vm4, %v2333_v46  ;;  %v1165_v29 = vld [vmem:[%s2647_s30] sm:$0xff]  ;;  %v1166_v30 = vld [vmem:[%s2647_s30 + $0x10] sm:$0xff]  ;;  %v1342_v36 = vld [vmem:[%s2647_s30 + $0x8] sm:$0xff] }
 0x429   : > { %1861 = vmatpush3.bf16.msra.mxu0 %v2077_v53  ;;  %v1343_v37 = vld [vmem:[%s2647_s30 + $0x18] sm:$0xff] }
 0x42a   : > { %1862 = vmatprep.subr.bf16.mxu0 %v2333_v46 }
 0x42b   : > { %1837 = vmatpush3.bf16.msra.mxu1 %v2075_v52 }
 0x42c   : > { %1838 = vmatprep.subr.bf16.mxu1 %v2333_v46 }
 0x42d   : > { %1863 = vmatpush3.bf16.msra.mxu0 %v2079_v54 }
 0x42e   : > { %1864 = vmatprep.subr.bf16.mxu0 %v2333_v46 }
 0x42f   : > { %1839 = vmatpush3.bf16.msra.mxu1 %v2076_v55 }
 0x430   : > { %1840 = vmatprep.subr.bf16.mxu1 %v2333_v46 }
 0x431   : > { %1865 = vmatpush3.bf16.msra.mxu0 %v2081_v56 }
 0x432   : > { %1866 = vmatprep.subr.bf16.mxu0 %v2333_v46 }
 0x433   : > { %1841 = vmatpush3.bf16.msra.mxu1 %v2078_v57 }
 0x434   : > { %1842 = vmatprep.subr.bf16.mxu1 %v2333_v46 }
 0x435   : > { %1867 = vmatpush3.bf16.msra.mxu0 %v2083_v59 }
 0x436   : > { %1868 = vmatprep.subr.bf16.mxu0 %v2333_v46 }
 0x437   : > { %1843 = vmatpush3.bf16.msra.mxu1 %v2080_v58 }
 0x438   : > { %1844 = vmatprep.subr.bf16.mxu1 %v2333_v46 }
 0x439   : > { %1869 = vmatpush3.bf16.msra.mxu0 %v2085_v60 }
 0x43a   : > { %1870 = vmatprep.subr.bf16.mxu0 %v2333_v46 }
 0x43b   : > { %1845 = vmatpush3.bf16.msra.mxu1 %v2082_v61 }
 0x43c   : > { %1846 = vmatprep.subr.bf16.mxu1 %v2333_v46 }
 0x43d   : > { %1871 = vmatpush3.bf16.msra.mxu0 %v2087_v62 }
 0x43e   : > { %1872 = vmatprep.subr.bf16.mxu0 %v2333_v46 }
 0x43f   : > { %1847 = vmatpush3.bf16.msra.mxu1 %v2084_v63 }
 0x440   : > { %1848 = vmatprep.subr.bf16.mxu1 %v2333_v46 }
 0x441   : > { %1873 = vmatpush3.bf16.msra.mxu0 %v2088_v0 }
 0x442   : > { %1874 = vmatprep.subr.bf16.mxu0 %v2333_v46 }
 0x443   : > { %1849 = vmatpush3.bf16.msra.mxu1 %v2086_v1 }
 0x445   : > { %1875 = vmatpush3.bf16.msra.mxu0 %v2089_v2 }
 0x4f9   : > { %v1046_v3 = vpop.f32.mrb[0].mxu1  ;;  %v1223_v6 = vpop.f32.mrb[0].mxu0 }
 0x4fa   : > { %v1832_v4 = vpop.f32.mrb[1].mxu1  ;;  %v1858_v9 = vpop.f32.mrb[1].mxu0 }
 0x4fb   : > { %v1049_v5 = vpop.f32.mrb[2].mxu1  ;;  %v1226_v10 = vpop.f32.mrb[2].mxu0 }
 0x4fc   : > { %v1053_v7 = vpack.c.bf16 %v1049_v5, %v1046_v3  ;;  %v1833_v8 = vpop.f32.mrb[3].mxu1  ;;  %v1230_v11 = vpack.c.bf16 %v1226_v10, %v1223_v6  ;;  %v1859_v12 = vpop.f32.mrb[3].mxu0 }
 0x4fe   : > { %1851 = vmatmul.mubr.bf16.vlgmr.msra.gmra.mrb[4].mxu1 %v1053_v7  ;;  %1877 = vmatmul.mubr.bf16.vlgmr.msra.gmra.mrb[4].mxu0 %v1230_v11 }
 0x5d1   : > { %v1154_v13 = vpop.f32.mrb[4].mxu1  ;;  %v1331_v17 = vpop.f32.mrb[4].mxu0 }
 0x5d2   : > { %v1155_v14 = vadd.f32 1.0, %v1154_v13  ;;  %v1852_v15 = vpop.f32.mrb[5].mxu1  ;;  %v1332_v20 = vadd.f32 1.0, %v1331_v17  ;;  %v1878_v21 = vpop.f32.mrb[5].mxu0 }
 0x5d3   : > { %v1157_v16 = vpop.f32.mrb[6].mxu1  ;;  %v1334_v22 = vpop.f32.mrb[6].mxu0 }
 0x5d4   : > { %2090 = vlog2.f32 %v1155_v14  ;;  %v1158_v18 = vadd.f32 1.0, %v1157_v16  ;;  %v1853_v19 = vpop.f32.mrb[7].mxu1  ;;  %v1335_v23 = vadd.f32 1.0, %v1334_v22  ;;  %v1879_v24 = vpop.f32.mrb[7].mxu0 }
 0x5d6   : > { %2092 = vlog2.f32 %v1158_v18 }
 0x5d7   : > { %2094 = vlog2.f32 %v1332_v20 }
 0x5d8   : > { %2096 = vlog2.f32 %v1335_v23 }
 0x5de   : > { %v2091_v26 = vpop.eup %2090 }
 0x5df   : > { %v1162_v27 = vmul.f32 0.6931472, %v2091_v26 }
 0x5e0   : > { %v2093_v28 = vpop.eup %2092 }
 0x5e1   : > { %v2095_v31 = vpop.eup %2094  ;;  %v1164_v32 = vmul.f32 0.6931472, %v2093_v28  ;;  %v2740_v38 = vadd.f32 %v1165_v29, %v1162_v27 }
 0x5e2   : > { %v2097_v34 = vpop.eup %2096  ;;  %v1339_v35 = vmul.f32 0.6931472, %v2095_v31 }
 0x5e3   : > { %v2742_v39 = vadd.f32 %v1166_v30, %v1164_v32  ;;  %v1341_v40 = vmul.f32 0.6931472, %v2097_v34  ;;  %v1363_v46 = vsel %vm1350_vm6, %v2740_v38, inf }
 0x5e4   : > { %v2744_v41 = vadd.f32 %v1342_v36, %v1339_v35 }
 0x5e5   : > { %v2746_v42 = vadd.f32 %v1343_v37, %v1341_v40  ;;  %v1353_v43 = vmax.f32 %v2740_v38, %v2742_v39  ;;  %v1364_v44 = vsel %vm1350_vm6, %v2742_v39, inf }
 0x5e6   : > { %v1365_v48 = vmin.f32 %v1363_v46, %v1364_v44  ;;  %v1388_v49 = vsel %vm1350_vm6, %v2744_v41, inf }
 0x5e7   : > { %1354 = vmax.xlane.f32.xlu0 %v1353_v43  ;;  %v1377_v45 = vmax.f32 %v2744_v41, %v2746_v42  ;;  %v1389_v47 = vsel %vm1350_vm6, %v2746_v42, inf }
 0x5e8   : > { %v1390_v50 = vmin.f32 %v1388_v49, %v1389_v47 }
 0x5e9   : > { %1378 = vmax.xlane.f32.xlu1 %v1377_v45 }
 0x5eb   : > { %1366 = vmin.xlane.f32.xlu0 %v1365_v48 }
 0x5ed   : > { %1391 = vmin.xlane.f32.xlu1 %v1390_v50 }
 0x674   : > { %v1355_v51 = vpop.xlane.xlu0 %1354 }
 0x675   : > { %v1356_v52 = vrot.slane %v1355_v51, 4 }
 0x676   : > { %v1379_v53 = vpop.xlane.xlu1 %1378 }
 0x677   : > { %v1357_v54 = vmax.f32 %v1355_v51, %v1356_v52  ;;  %v1380_v55 = vrot.slane %v1379_v53, 4 }
 0x678   : > { %v1367_v56 = vpop.xlane.xlu0 %1366 }
 0x679   : > { %v1358_v57 = vrot.slane %v1357_v54, 2  ;;  %v1368_v58 = vrot.slane %v1367_v56, 4  ;;  %v1381_v59 = vmax.f32 %v1379_v53, %v1380_v55 }
 0x67a   : > { %v1392_v60 = vpop.xlane.xlu1 %1391 }
 0x67b   : > { %v1369_v61 = vmin.f32 %v1367_v56, %v1368_v58  ;;  %v1382_v62 = vrot.slane %v1381_v59, 2  ;;  %v1393_v63 = vrot.slane %v1392_v60, 4  ;;  %v1359_v0 = vmax.f32 %v1357_v54, %v1358_v57 }
 0x67d   : > { %v1370_v1 = vrot.slane %v1369_v61, 2  ;;  %v1394_v2 = vmin.f32 %v1392_v60, %v1393_v63  ;;  %v1360_v3 = vrot.slane %v1359_v0, 1  ;;  %v1383_v4 = vmax.f32 %v1381_v59, %v1382_v62 }
 0x67f   : > { %v1371_v5 = vmin.f32 %v1369_v61, %v1370_v1  ;;  %v1395_v6 = vrot.slane %v1394_v2, 2  ;;  %v1361_v7 = vmax.f32 %v1359_v0, %v1360_v3  ;;  %v1384_v8 = vrot.slane %v1383_v4, 1 }
 0x681   : > { %v1396_v9 = vmin.f32 %v1394_v2, %v1395_v6  ;;  %1880 = vpush %v1361_v7  ;;  %v1372_v10 = vrot.slane %v1371_v5, 1  ;;  %v1385_v13 = vmax.f32 %v1383_v4, %v1384_v8 }
 0x683   : > { %v1373_v11 = vmin.f32 %v1371_v5, %v1372_v10  ;;  %v1397_v12 = vrot.slane %v1396_v9, 1 }
 0x685   : > { %1882 = vpush %v1373_v11  ;;  %v1398_v14 = vmin.f32 %v1396_v9, %v1397_v12 }
 0x686   : > { %1884 = vpush %v1385_v13 }
 0x687   : > { %1886 = vpush %v1398_v14 }
 0x6b2   : > { %s1881_s18 = spop %1880 }
 0x6b6   : > { %s1883_s28 = spop %1882 }
 0x6b7   : > { %s1885_s29 = spop %1884 }
 0x6b8   : > { %s1387_s7 = smax.f32 %s1885_s29, %s1881_s18  ;;  %s1887_s8 = spop %1886 }
 0x6b9   : > { %s1400_s15 = smin.f32 %s1887_s8, %s1883_s28 }
 0x6ba   : > { %s1401_s4 = ssub.f32 %s1387_s7, %s1400_s15  ;;  %v1405_v17 = vstv %s1400_s15 }
 0x6bb   : > { %v1406_v18 = vsub.f32 %v2740_v38, %v1405_v17  ;;  %v1407_v19 = vsub.f32 %v2742_v39, %v1405_v17  ;;  %v1415_v20 = vsub.f32 %v2744_v41, %v1405_v17  ;;  %v1416_v21 = vsub.f32 %v2746_v42, %v1405_v17 }
 0x6bc   : > { %v1402_v15 = vstv %s1401_s4 }
 0x6bd   : > { %2098 = vrcp.f32 %v1402_v15 }
 0x6c7   : > { %v2099_v16 = vpop.eup %2098 }
 0x6c8   : > { %1888 = vpush %v2099_v16 }
 0x6f9   : > { %s1889_s5 = spop %1888 }
 0x6fa   : > { %v1408_v22 = vstv %s1889_s5 }
 0x6fb   : > { %v1409_v23 = vmul.f32 %v1408_v22, %v1406_v18  ;;  %v1410_v24 = vmul.f32 %v1408_v22, %v1407_v19  ;;  %v1417_v25 = vmul.f32 %v1415_v20, %v1408_v22  ;;  %v1418_v26 = vmul.f32 %v1416_v21, %v1408_v22 }
 0x6fd   : > { %1411 = vst [vmem:[%s2647_s30] sm:$0xff] %v1409_v23  ;;  %1412 = vst [vmem:[%s2647_s30 + $0x10] sm:$0xff] %v1410_v24 }
 0x6fe   : > { %1419 = vst [vmem:[%s2647_s30 + $0x8] sm:$0xff] %v1417_v25  ;;  %1420 = vst [vmem:[%s2647_s30 + $0x18] sm:$0xff] %v1418_v26 }
 0x6ff PF: > { %s1657_s10 = sshll.u32 %s2308_s19, 9  ;;  %s1435_s11 = sshll.u32 %s2647_s30, 4  ;;  %s2771_s11 = int_to_ptr.vmem [resolvable:$true] %s1435_s11 }
 0x700   : > { %s2768_s26 = scalar_lea.hbm %s2837_s3, %s1657_s10  ;;  %s1422_s27 = scalar_lea.sflag [#allocation5], %s2637_s9 }
 0x701   : > { %s2190_s23 = scalar_lea.vmem %s2771_s11, 512  ;;  %p2871_p10 = scmp.ne.s32.totalorder %s2865_s25, 0 }
 0x702   : > { %p2191_p4 = scmp.ne.s32.totalorder %s2771_s11, %s2190_s23  ;;  %s2335_s18 = smov [#allocation9]  }
 0x703   : > { %s2194_s28 = sshll.u32 %s2335_s18, 4  ;;  %s2195_s28 = int_to_ptr.vmem [resolvable:$false] %s2194_s28 }
 0x704   : > { %p2192_p1 = pnand %p2191_p4, %p2871_p10  ;;  %s2196_s19 = scalar_lea.vmem %s2195_s28, 1024 }
 0x705   : > { %p2197_p12 = scmp.lt.s32.totalorder %s2771_s11, %s2195_s28  ;;  %p2198_p6 = scmp.lt.s32.totalorder %s2196_s19, %s2190_s23 }
 0x706   : > { %p2193_p13 = pneg %p2192_p1 }
 0x707   : > { %p2199_p8 = por %p2198_p6, %p2197_p12 }
 0x709   : > { %p2200_p2 = pnand %p2199_p8, %p2193_p13 }
 0x70b   : > { %2203 = shalt.err (!%p2200_p2)
}
 0x70c   : > { %s2204_s30 = scalar_lea.hbm %s2768_s26, 512  ;;  %s2208_s8 = scalar_lea.hbm %s2837_s3, 2048 }
 0x70d   : > { %p2205_p5 = scmp.ne.s32.totalorder %s2768_s26, %s2204_s30  ;;  %p2209_p11 = scmp.lt.u32.totalorder %s2768_s26, %s2837_s3 }
 0x70e   : > { %p2210_p9 = scmp.lt.u32.totalorder %s2208_s8, %s2204_s30  ;;  %p2212_p4 = scmp.lt.u32.totalorder %s2204_s30, %s2768_s26 }
 0x70f   : > { %p2206_p7 = pnand %p2205_p5, %p2871_p10 }
 0x710   : > { %p2211_p3 = por %p2210_p9, %p2209_p11 }
 0x711   : > { %p2207_p0 = pneg %p2206_p7 }
 0x712   : > { %p2213_p1 = por %p2212_p4, %p2211_p3 }
 0x714   : > { %p2214_p13 = pnand %p2213_p1, %p2207_p0 }
 0x716   : > { %2217 = shalt.err (!%p2214_p13)
}
 0x717   : > { %s2336_s5 = smov 256   ;;  %s2337_s10 = smov 16  }
 0x718   : > { %1896 = dma.vmem_to_hbm [thread:$0]  (%p2871_p10), %s2771_s11, 512, %s2768_s26, %s1422_s27, %s2336_s5, %s2336_s5, %s2337_s10  }
 0x719 PF: > { %p1913_p12 = scmp.ge.s32.totalorder %s2320_s22, 2  ;;  %s1450_s24 = sand.u32 1, %s2280_s12  }
 0x71a   : > { %p2872_p6 = scmp.ne.s32.totalorder %s2866_s1, 0  ;;  %s1451_s0 = scalar_lea.sflag [#allocation5], %s1450_s24 }
 0x71c   : > { %p1909_p8 = pnand %p1913_p12, %p2872_p6 }
 0x71e   : > { %2275 = dma.done.wait (!%p1909_p8), %s1451_s0, 512  }
 0x71f   : > { %2277 = vsyncadd (!%p1909_p8), %s1451_s0, 4294966784  ;;  %s22_s22 = sadd.s32 1, %s2320_s22   ;;  %s2873_s25 = sld [smem:[#allocation15_spill]] }
 0x720   : > { %p19_p2 = scmp.ge.s32.totalorder %s22_s22, 14   ;;  %s2874_s9 = sld [smem:[#allocation14_spill]] }
 0x721   : > { %s2875_s26 = sld [smem:[#allocation16_spill]]  ;;  %s2876_s12 = smov %s2284_s13 }
 0x722   : > { %s2877_s13 = smov %s2288_s14  ;;  %s2878_s14 = smov %s2577_s6 }
 0x723   : > { %s2879_s15 = smov %s2296_s16  ;;  %s2880_s16 = smov %s2300_s17 }
 0x724   : > { %s2882_s18 = smov %s2312_s20  ;;  %s2883_s19 = smov %s2316_s21 }
 0x725   : > { %s2881_s17 = smov %s2873_s25  ;;  %21 = sbr.rel (!%p19_p2) target bundleno = 14 (0xe), region = 113 }
 0x726   : > { %s2884_s20 = smov %s2874_s9 }
 0x727   : > { %s2885_s21 = smov %s2875_s26 }
 0x72c   :  { %1456 = vsyncpa [#allocation4], 1 }
 0x72d   :  { %1458 = vsyncpa [#allocation4 + $0x1], 1 }
 0x72e   :  { %1459 = vsyncpa [#allocation7], 1 }
 0x72f   :  { %1461 = vsyncpa [#allocation7 + $0x1], 1 }
 0x730   :  { %1462 = vsyncpa [#allocation5], 1 }
 0x731   :  { %1464 = vsyncpa [#allocation5 + $0x1], 1 }

</bundles_post_ra>
